<compile_context>
chip_gen: v5e
topology: v5e:2x2
jax: 0.10.0
libtpu: 0.0.40
codegen_flags: <defaults>
</compile_context>

<pallas_src>
import jax
import jax.numpy as jnp
from jax.experimental import pallas as pl
from jax.experimental.pallas import tpu as pltpu

PATCH = 4


# ----------------------------------------------------------------------------
# In-kernel helpers (operate on VMEM values, f32 elementwise / bf16 matmul)
# ----------------------------------------------------------------------------
def _layer_norm(x, gamma, beta, eps=1e-5):
    mu = jnp.mean(x, axis=-1, keepdims=True)
    var = jnp.mean(jnp.square(x - mu), axis=-1, keepdims=True)
    return (x - mu) * jax.lax.rsqrt(var + eps) * gamma + beta


def _vss_block(s, gamma, beta, w_gate, b_gate, w2, b2):
    """Residual VSS surrogate:  s + (SiLU(h@W1) * SiLU(h@Wg)) @ W2,  h = LN(s).
    W1||Wg are pre-concatenated into w_gate (D, 2H) for one lane-dense dot."""
    hidden = w_gate.shape[1] // 2
    h = _layer_norm(s, gamma, beta)
    y = jnp.dot(h.astype(jnp.bfloat16), w_gate,
                preferred_element_type=jnp.float32) + b_gate
    u = y[:, :hidden]
    z = y[:, hidden:]
    u = u * jax.nn.sigmoid(u)          # SiLU
    z = z * jax.nn.sigmoid(z)          # SiLU gate
    out = jnp.dot((u * z).astype(jnp.bfloat16), w2,
                  preferred_element_type=jnp.float32) + b2
    return s + out


# ----------------------------------------------------------------------------
# Fused forward kernel (one grid program per batch element)
# ----------------------------------------------------------------------------
def _vmunet_fused_kernel(
    patches_ref,
    embed_w_ref, embed_b_ref,
    g1_ref, be1_ref, wg1_ref, bg1_ref, w21_ref, b21_ref,
    merge_w_ref, merge_b_ref,
    g2_ref, be2_ref, wg2_ref, bg2_ref, w22_ref, b22_ref,
    expand_w_ref, expand_b_ref,
    g3_ref, be3_ref, wg3_ref, bg3_ref, w23_ref, b23_ref,
    wf_ref, bf_ref,
    out_ref,
):
    n_tok = patches_ref.shape[0]          # stage-1 tokens for this batch element
    D = embed_w_ref.shape[1]
    q = n_tok // 4                        # tokens per 2x2 row block = stage-2 tokens

    # ---- patch embed: 4x4 stride-4 conv == per-patch matmul ----------------
    t = jnp.dot(patches_ref[...], embed_w_ref[...],
                preferred_element_type=jnp.float32) + embed_b_ref[...]

    # ---- encoder stage 1 (VSS surrogate, no skip) --------------------------
    t1 = _vss_block(t, g1_ref[...], be1_ref[...], wg1_ref[...], bg1_ref[...],
                    w21_ref[...], b21_ref[...])

    # ---- patch merging 2x2 -> 2D channels ----------------------------------
    # Token order is (dh, dw, h2, w2): row block k = dh*2+dw holds every
    # stage-2 position, so merged @ Wm = sum of 4 partial matmuls (no
    # transpose / gather needed inside the kernel).
    mw = merge_w_ref[...]
    acc = jnp.dot(t1[0:q].astype(jnp.bfloat16), mw[0:D, :],
                  preferred_element_type=jnp.float32)
    for k in range(1, 4):
        acc = acc + jnp.dot(t1[k * q:(k + 1) * q].astype(jnp.bfloat16),
                            mw[k * D:(k + 1) * D, :],
                            preferred_element_type=jnp.float32)
    t2 = acc + merge_b_ref[...]

    # ---- encoder stage 2 / bottleneck (no skip) ----------------------------
    t2 = _vss_block(t2, g2_ref[...], be2_ref[...], wg2_ref[...], bg2_ref[...],
                    w22_ref[...], b22_ref[...])

    # ---- patch expanding x2: 2D -> 4D -> four row blocks of D --------------
    e4 = jnp.dot(t2.astype(jnp.bfloat16), expand_w_ref[...],
                 preferred_element_type=jnp.float32) + expand_b_ref[...]
    e = jnp.concatenate([e4[:, k * D:(k + 1) * D] for k in range(4)], axis=0)

    # ---- decoder stage 1 with skip connection from t1 ----------------------
    d1 = _vss_block(e + t1, g3_ref[...], be3_ref[...], wg3_ref[...],
                    bg3_ref[...], w23_ref[...], b23_ref[...])

    # ---- fused final patch-expand x4 + 1x1 head (lane-dense output) --------
    out = jnp.dot(d1.astype(jnp.bfloat16), wf_ref[...],
                  preferred_element_type=jnp.float32) + bf_ref[...]
    out_ref[...] = out.astype(out_ref.dtype)


# ----------------------------------------------------------------------------
# Parameter construction (deterministic, synthetic) and fusion/packing
# ----------------------------------------------------------------------------
def _dense(key, kin, kout):
    w = jax.random.normal(key, (kin, kout), jnp.float32) * (1.0 / jnp.sqrt(kin))
    b = jnp.zeros((kout,), jnp.float32)
    return w, b


def _block(key, d, h):
    k1, k2, k3 = jax.random.split(key, 3)
    w1, b1 = _dense(k1, d, h)
    wg, bg = _dense(k2, d, h)
    w2, b2 = _dense(k3, h, d)
    return dict(gamma=jnp.ones((1, d), jnp.float32),
                beta=jnp.zeros((1, d), jnp.float32),
                w1=w1, b1=b1, wg=wg, bg=bg, w2=w2, b2=b2)


def init_params(key, in_dim, out_dim, embed_dim=32, mlp_ratio=2, patch=PATCH):
    D = embed_dim
    assert D % 4 == 0
    ks = jax.random.split(key, 8)
    p = {}
    p["embed_w"], p["embed_b"] = _dense(ks[0], in_dim * patch * patch, D)  # 4x4 s4 conv
    p["enc1"] = _block(ks[1], D, mlp_ratio * D)
    p["merge_w"], p["merge_b"] = _dense(ks[2], 4 * D, 2 * D)               # patch merging
    p["enc2"] = _block(ks[3], 2 * D, mlp_ratio * 2 * D)
    p["expand_w"], p["expand_b"] = _dense(ks[4], 2 * D, 4 * D)             # patch expand x2
    p["dec1"] = _block(ks[5], D, mlp_ratio * D)
    p["final_expand_w"], p["final_expand_b"] = _dense(ks[6], D, 4 * D)     # final expand x4
    p["head_w"], p["head_b"] = _dense(ks[7], D // 4, out_dim)              # 1x1 conv head
    return p


def prepare_params(p, patch=PATCH):
    """Fuse gate weights, fold the 1x1 head into the final expand, cast matmul
    operands to bf16 (MXU native); LayerNorm params and biases stay f32."""
    D = p["embed_w"].shape[1]
    out_dim = p["head_w"].shape[1]
    df = D // 4
    pp = patch * patch

    def blk(b):
        return dict(
            gamma=b["gamma"].astype(jnp.float32),
            beta=b["beta"].astype(jnp.float32),
            w_gate=jnp.concatenate([b["w1"], b["wg"]], axis=1).astype(jnp.bfloat16),
            b_gate=jnp.concatenate([b["b1"], b["bg"]])[None, :].astype(jnp.float32),
            w2=b["w2"].astype(jnp.bfloat16),
            b2=b["b2"][None, :].astype(jnp.float32),
        )

    # W_fused[d, (py,px,od)] = sum_df final_expand_w[d, (py,px,df)] * head_w[df, od]
    wf = jnp.einsum("dpf,fo->dpo",
                    p["final_expand_w"].reshape(D, pp, df),
                    p["head_w"]).reshape(D, pp * out_dim)
    bf = (p["final_expand_b"].reshape(pp, df) @ p["head_w"]
          + p["head_b"][None, :]).reshape(1, pp * out_dim)

    return dict(
        embed_w=p["embed_w"].astype(jnp.bfloat16),
        embed_b=p["embed_b"][None, :].astype(jnp.float32),
        enc1=blk(p["enc1"]),
        merge_w=p["merge_w"].astype(jnp.bfloat16),
        merge_b=p["merge_b"][None, :].astype(jnp.float32),
        enc2=blk(p["enc2"]),
        expand_w=p["expand_w"].astype(jnp.bfloat16),
        expand_b=p["expand_b"][None, :].astype(jnp.float32),
        dec1=blk(p["dec1"]),
        wf=wf.astype(jnp.bfloat16),
        bf=bf.astype(jnp.float32),
    )


# ----------------------------------------------------------------------------
# Forward pass: one pallas_call; only input patching / output NCHW transposes
# (unavoidable) plus free HBM reshapes remain outside the kernel.
# ----------------------------------------------------------------------------
def forward(prep, x_nchw):
    B, C, H, W = x_nchw.shape
    P = PATCH
    hh, ww = H // P, W // P
    h2, w2 = hh // 2, ww // 2
    n_tok = hh * ww
    n_out = prep["wf"].shape[1]              # P*P*out_dim (lane-dense, >=128 here)
    out_dim = n_out // (P * P)
    cpp = C * P * P

    # Patch extraction in (dh, dw, h2, w2) token order so the in-kernel 2x2
    # merge/expand are contiguous row-block slices.
    xp = x_nchw.reshape(B, C, h2, 2, P, w2, 2, P)
    xp = xp.transpose(0, 3, 6, 2, 5, 1, 4, 7)        # (B, dh, dw, h2, w2, C, py, px)
    patches = xp.reshape(B * n_tok, cpp).astype(jnp.bfloat16)

    weights = (
        prep["embed_w"], prep["embed_b"],
        prep["enc1"]["gamma"], prep["enc1"]["beta"], prep["enc1"]["w_gate"],
        prep["enc1"]["b_gate"], prep["enc1"]["w2"], prep["enc1"]["b2"],
        prep["merge_w"], prep["merge_b"],
        prep["enc2"]["gamma"], prep["enc2"]["beta"], prep["enc2"]["w_gate"],
        prep["enc2"]["b_gate"], prep["enc2"]["w2"], prep["enc2"]["b2"],
        prep["expand_w"], prep["expand_b"],
        prep["dec1"]["gamma"], prep["dec1"]["beta"], prep["dec1"]["w_gate"],
        prep["dec1"]["b_gate"], prep["dec1"]["w2"], prep["dec1"]["b2"],
        prep["wf"], prep["bf"],
    )

    row = lambda b: (b, 0)                   # per-batch row block
    rep = lambda b: (0, 0)                   # weights resident across the grid
    w_specs = [pl.BlockSpec(w.shape, rep) for w in weights]

    out = pl.pallas_call(
        _vmunet_fused_kernel,
        out_shape=jax.ShapeDtypeStruct((B * n_tok, n_out), jnp.float32),
        grid=(B,),                           # >=2 parallel programs -> both v7x TCs
        in_specs=[pl.BlockSpec((n_tok, cpp), row)] + w_specs,
        out_specs=pl.BlockSpec((n_tok, n_out), row),
        compiler_params=pltpu.CompilerParams(
            dimension_semantics=("parallel",),
            vmem_limit_bytes=32 * 1024 * 1024,   # scaling guard (v7x: 64 MiB phys)
        ),
    )(patches, *weights)

    # Back to NCHW.
    out = out.reshape(B, 2, 2, h2, w2, P, P, out_dim)
    out = out.transpose(0, 7, 3, 1, 5, 4, 2, 6)      # (B, od, h2, dh, py, w2, dw, px)
    return out.reshape(B, out_dim, H, W)


# ----------------------------------------------------------------------------
if __name__ == "__main__":
    key = jax.random.PRNGKey(0)
    kx, kp = jax.random.split(key)

    # Small shapes consistent with fMRIDecoder(in_dim, out_dim) on NCHW input.
    B, C_in, H, W = 2, 16, 16, 16
    out_dim = 8

    x = jax.random.normal(kx, (B, C_in, H, W), jnp.float32)
    params = init_params(kp, in_dim=C_in, out_dim=out_dim, embed_dim=32)
    prep = prepare_params(params)

    fwd = jax.jit(forward)
    y = fwd(prep, x)
    y = jax.block_until_ready(y)

    assert y.shape == (B, out_dim, H, W), y.shape
    assert bool(jnp.all(jnp.isfinite(y)))
    print("KERNEL_OK")
</pallas_src>

<mosaic_0001>
module attributes {stable_mosaic.version = 11 : i64} {
  func.func @_vmunet_fused_kernel(%arg0: i32, %arg1: memref<16x256xbf16, #tpu.memory_space<vmem>>, %arg2: memref<256x32xbf16, #tpu.memory_space<vmem>>, %arg3: memref<1x32xf32, #tpu.memory_space<vmem>>, %arg4: memref<1x32xf32, #tpu.memory_space<vmem>>, %arg5: memref<1x32xf32, #tpu.memory_space<vmem>>, %arg6: memref<32x128xbf16, #tpu.memory_space<vmem>>, %arg7: memref<1x128xf32, #tpu.memory_space<vmem>>, %arg8: memref<64x32xbf16, #tpu.memory_space<vmem>>, %arg9: memref<1x32xf32, #tpu.memory_space<vmem>>, %arg10: memref<128x64xbf16, #tpu.memory_space<vmem>>, %arg11: memref<1x64xf32, #tpu.memory_space<vmem>>, %arg12: memref<1x64xf32, #tpu.memory_space<vmem>>, %arg13: memref<1x64xf32, #tpu.memory_space<vmem>>, %arg14: memref<64x256xbf16, #tpu.memory_space<vmem>>, %arg15: memref<1x256xf32, #tpu.memory_space<vmem>>, %arg16: memref<128x64xbf16, #tpu.memory_space<vmem>>, %arg17: memref<1x64xf32, #tpu.memory_space<vmem>>, %arg18: memref<64x128xbf16, #tpu.memory_space<vmem>>, %arg19: memref<1x128xf32, #tpu.memory_space<vmem>>, %arg20: memref<1x32xf32, #tpu.memory_space<vmem>>, %arg21: memref<1x32xf32, #tpu.memory_space<vmem>>, %arg22: memref<32x128xbf16, #tpu.memory_space<vmem>>, %arg23: memref<1x128xf32, #tpu.memory_space<vmem>>, %arg24: memref<64x32xbf16, #tpu.memory_space<vmem>>, %arg25: memref<1x32xf32, #tpu.memory_space<vmem>>, %arg26: memref<32x128xbf16, #tpu.memory_space<vmem>>, %arg27: memref<1x128xf32, #tpu.memory_space<vmem>>, %arg28: memref<16x128xf32, #tpu.memory_space<vmem>>) attributes {dimension_semantics = [#tpu.dimension_semantics<parallel>], iteration_bounds = array<i64: 2>, scalar_prefetch = 0 : i64, scratch_operands = 0 : i64, tpu.core_type = #tpu.core_type<tc>, window_params = [{transform_indices = @transform_0, window_bounds = array<i64: 16, 256>}, {pipeline_mode = #tpu.pipeline_mode<synchronous>, transform_indices = @transform_1, window_bounds = array<i64: 256, 32>}, {pipeline_mode = #tpu.pipeline_mode<synchronous>, transform_indices = @transform_2, window_bounds = array<i64: 1, 32>}, {pipeline_mode = #tpu.pipeline_mode<synchronous>, transform_indices = @transform_3, window_bounds = array<i64: 1, 32>}, {pipeline_mode = #tpu.pipeline_mode<synchronous>, transform_indices = @transform_4, window_bounds = array<i64: 1, 32>}, {pipeline_mode = #tpu.pipeline_mode<synchronous>, transform_indices = @transform_5, window_bounds = array<i64: 32, 128>}, {pipeline_mode = #tpu.pipeline_mode<synchronous>, transform_indices = @transform_6, window_bounds = array<i64: 1, 128>}, {pipeline_mode = #tpu.pipeline_mode<synchronous>, transform_indices = @transform_7, window_bounds = array<i64: 64, 32>}, {pipeline_mode = #tpu.pipeline_mode<synchronous>, transform_indices = @transform_8, window_bounds = array<i64: 1, 32>}, {pipeline_mode = #tpu.pipeline_mode<synchronous>, transform_indices = @transform_9, window_bounds = array<i64: 128, 64>}, {pipeline_mode = #tpu.pipeline_mode<synchronous>, transform_indices = @transform_10, window_bounds = array<i64: 1, 64>}, {pipeline_mode = #tpu.pipeline_mode<synchronous>, transform_indices = @transform_11, window_bounds = array<i64: 1, 64>}, {pipeline_mode = #tpu.pipeline_mode<synchronous>, transform_indices = @transform_12, window_bounds = array<i64: 1, 64>}, {pipeline_mode = #tpu.pipeline_mode<synchronous>, transform_indices = @transform_13, window_bounds = array<i64: 64, 256>}, {pipeline_mode = #tpu.pipeline_mode<synchronous>, transform_indices = @transform_14, window_bounds = array<i64: 1, 256>}, {pipeline_mode = #tpu.pipeline_mode<synchronous>, transform_indices = @transform_15, window_bounds = array<i64: 128, 64>}, {pipeline_mode = #tpu.pipeline_mode<synchronous>, transform_indices = @transform_16, window_bounds = array<i64: 1, 64>}, {pipeline_mode = #tpu.pipeline_mode<synchronous>, transform_indices = @transform_17, window_bounds = array<i64: 64, 128>}, {pipeline_mode = #tpu.pipeline_mode<synchronous>, transform_indices = @transform_18, window_bounds = array<i64: 1, 128>}, {pipeline_mode = #tpu.pipeline_mode<synchronous>, transform_indices = @transform_19, window_bounds = array<i64: 1, 32>}, {pipeline_mode = #tpu.pipeline_mode<synchronous>, transform_indices = @transform_20, window_bounds = array<i64: 1, 32>}, {pipeline_mode = #tpu.pipeline_mode<synchronous>, transform_indices = @transform_21, window_bounds = array<i64: 32, 128>}, {pipeline_mode = #tpu.pipeline_mode<synchronous>, transform_indices = @transform_22, window_bounds = array<i64: 1, 128>}, {pipeline_mode = #tpu.pipeline_mode<synchronous>, transform_indices = @transform_23, window_bounds = array<i64: 64, 32>}, {pipeline_mode = #tpu.pipeline_mode<synchronous>, transform_indices = @transform_24, window_bounds = array<i64: 1, 32>}, {pipeline_mode = #tpu.pipeline_mode<synchronous>, transform_indices = @transform_25, window_bounds = array<i64: 32, 128>}, {pipeline_mode = #tpu.pipeline_mode<synchronous>, transform_indices = @transform_26, window_bounds = array<i64: 1, 128>}, {transform_indices = @transform_27, window_bounds = array<i64: 16, 128>}]} {
    %c0 = arith.constant 0 : index
    %c0_0 = arith.constant 0 : index
    %0 = vector.load %arg1[%c0, %c0_0] : memref<16x256xbf16, #tpu.memory_space<vmem>>, vector<16x256xbf16>
    %c0_1 = arith.constant 0 : index
    %c0_2 = arith.constant 0 : index
    %1 = vector.load %arg2[%c0_1, %c0_2] : memref<256x32xbf16, #tpu.memory_space<vmem>>, vector<256x32xbf16>
    %cst = arith.constant dense<0.000000e+00> : vector<16x32xf32>
    %2 = tpu.matmul %0, %1, %cst {dimension_numbers = #tpu.dot_dimension_numbers<[1], [0], [0], [1], [0, 0, 1, 1], [], []>} : vector<16x256xbf16>, vector<256x32xbf16>, vector<16x32xf32> -> vector<16x32xf32>
    %c0_3 = arith.constant 0 : index
    %c0_4 = arith.constant 0 : index
    %3 = vector.load %arg3[%c0_3, %c0_4] : memref<1x32xf32, #tpu.memory_space<vmem>>, vector<1x32xf32>
    %4 = vector.broadcast %3 : vector<1x32xf32> to vector<16x32xf32>
    %5 = arith.addf %2, %4 : vector<16x32xf32>
    %c0_5 = arith.constant 0 : index
    %c0_6 = arith.constant 0 : index
    %6 = vector.load %arg4[%c0_5, %c0_6] : memref<1x32xf32, #tpu.memory_space<vmem>>, vector<1x32xf32>
    %c0_7 = arith.constant 0 : index
    %c0_8 = arith.constant 0 : index
    %7 = vector.load %arg5[%c0_7, %c0_8] : memref<1x32xf32, #tpu.memory_space<vmem>>, vector<1x32xf32>
    %c0_9 = arith.constant 0 : index
    %c0_10 = arith.constant 0 : index
    %8 = vector.load %arg6[%c0_9, %c0_10] : memref<32x128xbf16, #tpu.memory_space<vmem>>, vector<32x128xbf16>
    %c0_11 = arith.constant 0 : index
    %c0_12 = arith.constant 0 : index
    %9 = vector.load %arg7[%c0_11, %c0_12] : memref<1x128xf32, #tpu.memory_space<vmem>>, vector<1x128xf32>
    %c0_13 = arith.constant 0 : index
    %c0_14 = arith.constant 0 : index
    %10 = vector.load %arg8[%c0_13, %c0_14] : memref<64x32xbf16, #tpu.memory_space<vmem>>, vector<64x32xbf16>
    %c0_15 = arith.constant 0 : index
    %c0_16 = arith.constant 0 : index
    %11 = vector.load %arg9[%c0_15, %c0_16] : memref<1x32xf32, #tpu.memory_space<vmem>>, vector<1x32xf32>
    %cst_17 = arith.constant dense<0.000000e+00> : vector<16xf32>
    %12 = vector.multi_reduction <add>, %5, %cst_17 [1] : vector<16x32xf32> to vector<16xf32>
    %13 = vector.shape_cast %12 : vector<16xf32> to vector<16x1xf32>
    %cst_18 = arith.constant 3.200000e+01 : f32
    %14 = vector.broadcast %cst_18 : f32 to vector<16x1xf32>
    %15 = arith.divf %13, %14 : vector<16x1xf32>
    %16 = vector.broadcast %15 : vector<16x1xf32> to vector<16x32xf32>
    %17 = arith.subf %5, %16 : vector<16x32xf32>
    %18 = arith.mulf %17, %17 : vector<16x32xf32>
    %cst_19 = arith.constant dense<0.000000e+00> : vector<16xf32>
    %19 = vector.multi_reduction <add>, %18, %cst_19 [1] : vector<16x32xf32> to vector<16xf32>
    %20 = vector.shape_cast %19 : vector<16xf32> to vector<16x1xf32>
    %cst_20 = arith.constant 3.200000e+01 : f32
    %21 = vector.broadcast %cst_20 : f32 to vector<16x1xf32>
    %22 = arith.divf %20, %21 : vector<16x1xf32>
    %23 = vector.broadcast %15 : vector<16x1xf32> to vector<16x32xf32>
    %24 = arith.subf %5, %23 : vector<16x32xf32>
    %cst_21 = arith.constant 9.99999974E-6 : f32
    %25 = vector.broadcast %cst_21 : f32 to vector<16x1xf32>
    %26 = arith.addf %22, %25 : vector<16x1xf32>
    %27 = math.rsqrt %26 : vector<16x1xf32>
    %28 = vector.broadcast %27 : vector<16x1xf32> to vector<16x32xf32>
    %29 = arith.mulf %24, %28 : vector<16x32xf32>
    %30 = vector.broadcast %6 : vector<1x32xf32> to vector<16x32xf32>
    %31 = arith.mulf %29, %30 : vector<16x32xf32>
    %32 = vector.broadcast %7 : vector<1x32xf32> to vector<16x32xf32>
    %33 = arith.addf %31, %32 : vector<16x32xf32>
    %34 = arith.truncf %33 : vector<16x32xf32> to vector<16x32xbf16>
    %cst_22 = arith.constant dense<0.000000e+00> : vector<16x128xf32>
    %35 = tpu.matmul %34, %8, %cst_22 {dimension_numbers = #tpu.dot_dimension_numbers<[1], [0], [0], [1], [0, 0, 1, 1], [], []>} : vector<16x32xbf16>, vector<32x128xbf16>, vector<16x128xf32> -> vector<16x128xf32>
    %36 = vector.broadcast %9 : vector<1x128xf32> to vector<16x128xf32>
    %37 = arith.addf %35, %36 : vector<16x128xf32>
    %38 = vector.extract_strided_slice %37 {offsets = [0, 0], sizes = [16, 64], strides = [1, 1]} : vector<16x128xf32> to vector<16x64xf32>
    %39 = vector.extract_strided_slice %37 {offsets = [0, 64], sizes = [16, 64], strides = [1, 1]} : vector<16x128xf32> to vector<16x64xf32>
    %40 = arith.negf %38 : vector<16x64xf32>
    %41 = math.exp %40 : vector<16x64xf32>
    %cst_23 = arith.constant 1.000000e+00 : f32
    %42 = vector.broadcast %cst_23 : f32 to vector<16x64xf32>
    %43 = arith.addf %42, %41 : vector<16x64xf32>
    %44 = arith.divf %42, %43 : vector<16x64xf32>
    %45 = arith.mulf %38, %44 : vector<16x64xf32>
    %46 = arith.negf %39 : vector<16x64xf32>
    %47 = math.exp %46 : vector<16x64xf32>
    %cst_24 = arith.constant 1.000000e+00 : f32
    %48 = vector.broadcast %cst_24 : f32 to vector<16x64xf32>
    %49 = arith.addf %48, %47 : vector<16x64xf32>
    %50 = arith.divf %48, %49 : vector<16x64xf32>
    %51 = arith.mulf %39, %50 : vector<16x64xf32>
    %52 = arith.mulf %45, %51 : vector<16x64xf32>
    %53 = arith.truncf %52 : vector<16x64xf32> to vector<16x64xbf16>
    %cst_25 = arith.constant dense<0.000000e+00> : vector<16x32xf32>
    %54 = tpu.matmul %53, %10, %cst_25 {dimension_numbers = #tpu.dot_dimension_numbers<[1], [0], [0], [1], [0, 0, 1, 1], [], []>} : vector<16x64xbf16>, vector<64x32xbf16>, vector<16x32xf32> -> vector<16x32xf32>
    %55 = vector.broadcast %11 : vector<1x32xf32> to vector<16x32xf32>
    %56 = arith.addf %54, %55 : vector<16x32xf32>
    %57 = arith.addf %5, %56 : vector<16x32xf32>
    %c0_26 = arith.constant 0 : index
    %c0_27 = arith.constant 0 : index
    %58 = vector.load %arg10[%c0_26, %c0_27] : memref<128x64xbf16, #tpu.memory_space<vmem>>, vector<128x64xbf16>
    %59 = vector.extract_strided_slice %57 {offsets = [0, 0], sizes = [4, 32], strides = [1, 1]} : vector<16x32xf32> to vector<4x32xf32>
    %60 = arith.truncf %59 : vector<4x32xf32> to vector<4x32xbf16>
    %61 = vector.extract_strided_slice %58 {offsets = [0, 0], sizes = [32, 64], strides = [1, 1]} : vector<128x64xbf16> to vector<32x64xbf16>
    %cst_28 = arith.constant dense<0.000000e+00> : vector<4x64xf32>
    %62 = tpu.matmul %60, %61, %cst_28 {dimension_numbers = #tpu.dot_dimension_numbers<[1], [0], [0], [1], [0, 0, 1, 1], [], []>} : vector<4x32xbf16>, vector<32x64xbf16>, vector<4x64xf32> -> vector<4x64xf32>
    %63 = vector.extract_strided_slice %57 {offsets = [4, 0], sizes = [4, 32], strides = [1, 1]} : vector<16x32xf32> to vector<4x32xf32>
    %64 = arith.truncf %63 : vector<4x32xf32> to vector<4x32xbf16>
    %65 = vector.extract_strided_slice %58 {offsets = [32, 0], sizes = [32, 64], strides = [1, 1]} : vector<128x64xbf16> to vector<32x64xbf16>
    %cst_29 = arith.constant dense<0.000000e+00> : vector<4x64xf32>
    %66 = tpu.matmul %64, %65, %cst_29 {dimension_numbers = #tpu.dot_dimension_numbers<[1], [0], [0], [1], [0, 0, 1, 1], [], []>} : vector<4x32xbf16>, vector<32x64xbf16>, vector<4x64xf32> -> vector<4x64xf32>
    %67 = arith.addf %62, %66 : vector<4x64xf32>
    %68 = vector.extract_strided_slice %57 {offsets = [8, 0], sizes = [4, 32], strides = [1, 1]} : vector<16x32xf32> to vector<4x32xf32>
    %69 = arith.truncf %68 : vector<4x32xf32> to vector<4x32xbf16>
    %70 = vector.extract_strided_slice %58 {offsets = [64, 0], sizes = [32, 64], strides = [1, 1]} : vector<128x64xbf16> to vector<32x64xbf16>
    %cst_30 = arith.constant dense<0.000000e+00> : vector<4x64xf32>
    %71 = tpu.matmul %69, %70, %cst_30 {dimension_numbers = #tpu.dot_dimension_numbers<[1], [0], [0], [1], [0, 0, 1, 1], [], []>} : vector<4x32xbf16>, vector<32x64xbf16>, vector<4x64xf32> -> vector<4x64xf32>
    %72 = arith.addf %67, %71 : vector<4x64xf32>
    %73 = vector.extract_strided_slice %57 {offsets = [12, 0], sizes = [4, 32], strides = [1, 1]} : vector<16x32xf32> to vector<4x32xf32>
    %74 = arith.truncf %73 : vector<4x32xf32> to vector<4x32xbf16>
    %75 = vector.extract_strided_slice %58 {offsets = [96, 0], sizes = [32, 64], strides = [1, 1]} : vector<128x64xbf16> to vector<32x64xbf16>
    %cst_31 = arith.constant dense<0.000000e+00> : vector<4x64xf32>
    %76 = tpu.matmul %74, %75, %cst_31 {dimension_numbers = #tpu.dot_dimension_numbers<[1], [0], [0], [1], [0, 0, 1, 1], [], []>} : vector<4x32xbf16>, vector<32x64xbf16>, vector<4x64xf32> -> vector<4x64xf32>
    %77 = arith.addf %72, %76 : vector<4x64xf32>
    %c0_32 = arith.constant 0 : index
    %c0_33 = arith.constant 0 : index
    %78 = vector.load %arg11[%c0_32, %c0_33] : memref<1x64xf32, #tpu.memory_space<vmem>>, vector<1x64xf32>
    %79 = vector.broadcast %78 : vector<1x64xf32> to vector<4x64xf32>
    %80 = arith.addf %77, %79 : vector<4x64xf32>
    %c0_34 = arith.constant 0 : index
    %c0_35 = arith.constant 0 : index
    %81 = vector.load %arg12[%c0_34, %c0_35] : memref<1x64xf32, #tpu.memory_space<vmem>>, vector<1x64xf32>
    %c0_36 = arith.constant 0 : index
    %c0_37 = arith.constant 0 : index
    %82 = vector.load %arg13[%c0_36, %c0_37] : memref<1x64xf32, #tpu.memory_space<vmem>>, vector<1x64xf32>
    %c0_38 = arith.constant 0 : index
    %c0_39 = arith.constant 0 : index
    %83 = vector.load %arg14[%c0_38, %c0_39] : memref<64x256xbf16, #tpu.memory_space<vmem>>, vector<64x256xbf16>
    %c0_40 = arith.constant 0 : index
    %c0_41 = arith.constant 0 : index
    %84 = vector.load %arg15[%c0_40, %c0_41] : memref<1x256xf32, #tpu.memory_space<vmem>>, vector<1x256xf32>
    %c0_42 = arith.constant 0 : index
    %c0_43 = arith.constant 0 : index
    %85 = vector.load %arg16[%c0_42, %c0_43] : memref<128x64xbf16, #tpu.memory_space<vmem>>, vector<128x64xbf16>
    %c0_44 = arith.constant 0 : index
    %c0_45 = arith.constant 0 : index
    %86 = vector.load %arg17[%c0_44, %c0_45] : memref<1x64xf32, #tpu.memory_space<vmem>>, vector<1x64xf32>
    %cst_46 = arith.constant dense<0.000000e+00> : vector<4xf32>
    %87 = vector.multi_reduction <add>, %80, %cst_46 [1] : vector<4x64xf32> to vector<4xf32>
    %88 = vector.shape_cast %87 : vector<4xf32> to vector<4x1xf32>
    %cst_47 = arith.constant 6.400000e+01 : f32
    %89 = vector.broadcast %cst_47 : f32 to vector<4x1xf32>
    %90 = arith.divf %88, %89 : vector<4x1xf32>
    %91 = vector.broadcast %90 : vector<4x1xf32> to vector<4x64xf32>
    %92 = arith.subf %80, %91 : vector<4x64xf32>
    %93 = arith.mulf %92, %92 : vector<4x64xf32>
    %cst_48 = arith.constant dense<0.000000e+00> : vector<4xf32>
    %94 = vector.multi_reduction <add>, %93, %cst_48 [1] : vector<4x64xf32> to vector<4xf32>
    %95 = vector.shape_cast %94 : vector<4xf32> to vector<4x1xf32>
    %cst_49 = arith.constant 6.400000e+01 : f32
    %96 = vector.broadcast %cst_49 : f32 to vector<4x1xf32>
    %97 = arith.divf %95, %96 : vector<4x1xf32>
    %98 = vector.broadcast %90 : vector<4x1xf32> to vector<4x64xf32>
    %99 = arith.subf %80, %98 : vector<4x64xf32>
    %cst_50 = arith.constant 9.99999974E-6 : f32
    %100 = vector.broadcast %cst_50 : f32 to vector<4x1xf32>
    %101 = arith.addf %97, %100 : vector<4x1xf32>
    %102 = math.rsqrt %101 : vector<4x1xf32>
    %103 = vector.broadcast %102 : vector<4x1xf32> to vector<4x64xf32>
    %104 = arith.mulf %99, %103 : vector<4x64xf32>
    %105 = vector.broadcast %81 : vector<1x64xf32> to vector<4x64xf32>
    %106 = arith.mulf %104, %105 : vector<4x64xf32>
    %107 = vector.broadcast %82 : vector<1x64xf32> to vector<4x64xf32>
    %108 = arith.addf %106, %107 : vector<4x64xf32>
    %109 = arith.truncf %108 : vector<4x64xf32> to vector<4x64xbf16>
    %cst_51 = arith.constant dense<0.000000e+00> : vector<4x256xf32>
    %110 = tpu.matmul %109, %83, %cst_51 {dimension_numbers = #tpu.dot_dimension_numbers<[1], [0], [0], [1], [0, 0, 1, 1], [], []>} : vector<4x64xbf16>, vector<64x256xbf16>, vector<4x256xf32> -> vector<4x256xf32>
    %111 = vector.broadcast %84 : vector<1x256xf32> to vector<4x256xf32>
    %112 = arith.addf %110, %111 : vector<4x256xf32>
    %113 = vector.extract_strided_slice %112 {offsets = [0, 0], sizes = [4, 128], strides = [1, 1]} : vector<4x256xf32> to vector<4x128xf32>
    %114 = vector.extract_strided_slice %112 {offsets = [0, 128], sizes = [4, 128], strides = [1, 1]} : vector<4x256xf32> to vector<4x128xf32>
    %115 = arith.negf %113 : vector<4x128xf32>
    %116 = math.exp %115 : vector<4x128xf32>
    %cst_52 = arith.constant 1.000000e+00 : f32
    %117 = vector.broadcast %cst_52 : f32 to vector<4x128xf32>
    %118 = arith.addf %117, %116 : vector<4x128xf32>
    %119 = arith.divf %117, %118 : vector<4x128xf32>
    %120 = arith.mulf %113, %119 : vector<4x128xf32>
    %121 = arith.negf %114 : vector<4x128xf32>
    %122 = math.exp %121 : vector<4x128xf32>
    %cst_53 = arith.constant 1.000000e+00 : f32
    %123 = vector.broadcast %cst_53 : f32 to vector<4x128xf32>
    %124 = arith.addf %123, %122 : vector<4x128xf32>
    %125 = arith.divf %123, %124 : vector<4x128xf32>
    %126 = arith.mulf %114, %125 : vector<4x128xf32>
    %127 = arith.mulf %120, %126 : vector<4x128xf32>
    %128 = arith.truncf %127 : vector<4x128xf32> to vector<4x128xbf16>
    %cst_54 = arith.constant dense<0.000000e+00> : vector<4x64xf32>
    %129 = tpu.matmul %128, %85, %cst_54 {dimension_numbers = #tpu.dot_dimension_numbers<[1], [0], [0], [1], [0, 0, 1, 1], [], []>} : vector<4x128xbf16>, vector<128x64xbf16>, vector<4x64xf32> -> vector<4x64xf32>
    %130 = vector.broadcast %86 : vector<1x64xf32> to vector<4x64xf32>
    %131 = arith.addf %129, %130 : vector<4x64xf32>
    %132 = arith.addf %80, %131 : vector<4x64xf32>
    %133 = arith.truncf %132 : vector<4x64xf32> to vector<4x64xbf16>
    %c0_55 = arith.constant 0 : index
    %c0_56 = arith.constant 0 : index
    %134 = vector.load %arg18[%c0_55, %c0_56] : memref<64x128xbf16, #tpu.memory_space<vmem>>, vector<64x128xbf16>
    %cst_57 = arith.constant dense<0.000000e+00> : vector<4x128xf32>
    %135 = tpu.matmul %133, %134, %cst_57 {dimension_numbers = #tpu.dot_dimension_numbers<[1], [0], [0], [1], [0, 0, 1, 1], [], []>} : vector<4x64xbf16>, vector<64x128xbf16>, vector<4x128xf32> -> vector<4x128xf32>
    %c0_58 = arith.constant 0 : index
    %c0_59 = arith.constant 0 : index
    %136 = vector.load %arg19[%c0_58, %c0_59] : memref<1x128xf32, #tpu.memory_space<vmem>>, vector<1x128xf32>
    %137 = vector.broadcast %136 : vector<1x128xf32> to vector<4x128xf32>
    %138 = arith.addf %135, %137 : vector<4x128xf32>
    %139 = vector.extract_strided_slice %138 {offsets = [0, 0], sizes = [4, 32], strides = [1, 1]} : vector<4x128xf32> to vector<4x32xf32>
    %140 = vector.extract_strided_slice %138 {offsets = [0, 32], sizes = [4, 32], strides = [1, 1]} : vector<4x128xf32> to vector<4x32xf32>
    %141 = vector.extract_strided_slice %138 {offsets = [0, 64], sizes = [4, 32], strides = [1, 1]} : vector<4x128xf32> to vector<4x32xf32>
    %142 = vector.extract_strided_slice %138 {offsets = [0, 96], sizes = [4, 32], strides = [1, 1]} : vector<4x128xf32> to vector<4x32xf32>
    %143 = tpu.concatenate %139, %140, %141, %142 in 0 : vector<4x32xf32>, vector<4x32xf32>, vector<4x32xf32>, vector<4x32xf32> -> vector<16x32xf32>
    %144 = arith.addf %143, %57 : vector<16x32xf32>
    %c0_60 = arith.constant 0 : index
    %c0_61 = arith.constant 0 : index
    %145 = vector.load %arg20[%c0_60, %c0_61] : memref<1x32xf32, #tpu.memory_space<vmem>>, vector<1x32xf32>
    %c0_62 = arith.constant 0 : index
    %c0_63 = arith.constant 0 : index
    %146 = vector.load %arg21[%c0_62, %c0_63] : memref<1x32xf32, #tpu.memory_space<vmem>>, vector<1x32xf32>
    %c0_64 = arith.constant 0 : index
    %c0_65 = arith.constant 0 : index
    %147 = vector.load %arg22[%c0_64, %c0_65] : memref<32x128xbf16, #tpu.memory_space<vmem>>, vector<32x128xbf16>
    %c0_66 = arith.constant 0 : index
    %c0_67 = arith.constant 0 : index
    %148 = vector.load %arg23[%c0_66, %c0_67] : memref<1x128xf32, #tpu.memory_space<vmem>>, vector<1x128xf32>
    %c0_68 = arith.constant 0 : index
    %c0_69 = arith.constant 0 : index
    %149 = vector.load %arg24[%c0_68, %c0_69] : memref<64x32xbf16, #tpu.memory_space<vmem>>, vector<64x32xbf16>
    %c0_70 = arith.constant 0 : index
    %c0_71 = arith.constant 0 : index
    %150 = vector.load %arg25[%c0_70, %c0_71] : memref<1x32xf32, #tpu.memory_space<vmem>>, vector<1x32xf32>
    %cst_72 = arith.constant dense<0.000000e+00> : vector<16xf32>
    %151 = vector.multi_reduction <add>, %144, %cst_72 [1] : vector<16x32xf32> to vector<16xf32>
    %152 = vector.shape_cast %151 : vector<16xf32> to vector<16x1xf32>
    %cst_73 = arith.constant 3.200000e+01 : f32
    %153 = vector.broadcast %cst_73 : f32 to vector<16x1xf32>
    %154 = arith.divf %152, %153 : vector<16x1xf32>
    %155 = vector.broadcast %154 : vector<16x1xf32> to vector<16x32xf32>
    %156 = arith.subf %144, %155 : vector<16x32xf32>
    %157 = arith.mulf %156, %156 : vector<16x32xf32>
    %cst_74 = arith.constant dense<0.000000e+00> : vector<16xf32>
    %158 = vector.multi_reduction <add>, %157, %cst_74 [1] : vector<16x32xf32> to vector<16xf32>
    %159 = vector.shape_cast %158 : vector<16xf32> to vector<16x1xf32>
    %cst_75 = arith.constant 3.200000e+01 : f32
    %160 = vector.broadcast %cst_75 : f32 to vector<16x1xf32>
    %161 = arith.divf %159, %160 : vector<16x1xf32>
    %162 = vector.broadcast %154 : vector<16x1xf32> to vector<16x32xf32>
    %163 = arith.subf %144, %162 : vector<16x32xf32>
    %cst_76 = arith.constant 9.99999974E-6 : f32
    %164 = vector.broadcast %cst_76 : f32 to vector<16x1xf32>
    %165 = arith.addf %161, %164 : vector<16x1xf32>
    %166 = math.rsqrt %165 : vector<16x1xf32>
    %167 = vector.broadcast %166 : vector<16x1xf32> to vector<16x32xf32>
    %168 = arith.mulf %163, %167 : vector<16x32xf32>
    %169 = vector.broadcast %145 : vector<1x32xf32> to vector<16x32xf32>
    %170 = arith.mulf %168, %169 : vector<16x32xf32>
    %171 = vector.broadcast %146 : vector<1x32xf32> to vector<16x32xf32>
    %172 = arith.addf %170, %171 : vector<16x32xf32>
    %173 = arith.truncf %172 : vector<16x32xf32> to vector<16x32xbf16>
    %cst_77 = arith.constant dense<0.000000e+00> : vector<16x128xf32>
    %174 = tpu.matmul %173, %147, %cst_77 {dimension_numbers = #tpu.dot_dimension_numbers<[1], [0], [0], [1], [0, 0, 1, 1], [], []>} : vector<16x32xbf16>, vector<32x128xbf16>, vector<16x128xf32> -> vector<16x128xf32>
    %175 = vector.broadcast %148 : vector<1x128xf32> to vector<16x128xf32>
    %176 = arith.addf %174, %175 : vector<16x128xf32>
    %177 = vector.extract_strided_slice %176 {offsets = [0, 0], sizes = [16, 64], strides = [1, 1]} : vector<16x128xf32> to vector<16x64xf32>
    %178 = vector.extract_strided_slice %176 {offsets = [0, 64], sizes = [16, 64], strides = [1, 1]} : vector<16x128xf32> to vector<16x64xf32>
    %179 = arith.negf %177 : vector<16x64xf32>
    %180 = math.exp %179 : vector<16x64xf32>
    %cst_78 = arith.constant 1.000000e+00 : f32
    %181 = vector.broadcast %cst_78 : f32 to vector<16x64xf32>
    %182 = arith.addf %181, %180 : vector<16x64xf32>
    %183 = arith.divf %181, %182 : vector<16x64xf32>
    %184 = arith.mulf %177, %183 : vector<16x64xf32>
    %185 = arith.negf %178 : vector<16x64xf32>
    %186 = math.exp %185 : vector<16x64xf32>
    %cst_79 = arith.constant 1.000000e+00 : f32
    %187 = vector.broadcast %cst_79 : f32 to vector<16x64xf32>
    %188 = arith.addf %187, %186 : vector<16x64xf32>
    %189 = arith.divf %187, %188 : vector<16x64xf32>
    %190 = arith.mulf %178, %189 : vector<16x64xf32>
    %191 = arith.mulf %184, %190 : vector<16x64xf32>
    %192 = arith.truncf %191 : vector<16x64xf32> to vector<16x64xbf16>
    %cst_80 = arith.constant dense<0.000000e+00> : vector<16x32xf32>
    %193 = tpu.matmul %192, %149, %cst_80 {dimension_numbers = #tpu.dot_dimension_numbers<[1], [0], [0], [1], [0, 0, 1, 1], [], []>} : vector<16x64xbf16>, vector<64x32xbf16>, vector<16x32xf32> -> vector<16x32xf32>
    %194 = vector.broadcast %150 : vector<1x32xf32> to vector<16x32xf32>
    %195 = arith.addf %193, %194 : vector<16x32xf32>
    %196 = arith.addf %144, %195 : vector<16x32xf32>
    %197 = arith.truncf %196 : vector<16x32xf32> to vector<16x32xbf16>
    %c0_81 = arith.constant 0 : index
    %c0_82 = arith.constant 0 : index
    %198 = vector.load %arg26[%c0_81, %c0_82] : memref<32x128xbf16, #tpu.memory_space<vmem>>, vector<32x128xbf16>
    %cst_83 = arith.constant dense<0.000000e+00> : vector<16x128xf32>
    %199 = tpu.matmul %197, %198, %cst_83 {dimension_numbers = #tpu.dot_dimension_numbers<[1], [0], [0], [1], [0, 0, 1, 1], [], []>} : vector<16x32xbf16>, vector<32x128xbf16>, vector<16x128xf32> -> vector<16x128xf32>
    %c0_84 = arith.constant 0 : index
    %c0_85 = arith.constant 0 : index
    %200 = vector.load %arg27[%c0_84, %c0_85] : memref<1x128xf32, #tpu.memory_space<vmem>>, vector<1x128xf32>
    %201 = vector.broadcast %200 : vector<1x128xf32> to vector<16x128xf32>
    %202 = arith.addf %199, %201 : vector<16x128xf32>
    %c0_86 = arith.constant 0 : index
    %c0_87 = arith.constant 0 : index
    %203 = vector.load %arg28[%c0_86, %c0_87] : memref<16x128xf32, #tpu.memory_space<vmem>>, vector<16x128xf32>
    tpu.vector_store %arg28[%c0_86, %c0_87], %202 {strides = array<i32>} : memref<16x128xf32, #tpu.memory_space<vmem>>, vector<16x128xf32>,
    return
  }
  func.func @transform_0(%arg0: i32) -> (i32, i32) {
    %c0_i32 = arith.constant 0 : i32
    %c0_i32_0 = arith.constant 0 : i32
    return %arg0, %c0_i32 : i32, i32
  }
  func.func @transform_1(%arg0: i32) -> (i32, i32) {
    %c0_i32 = arith.constant 0 : i32
    %c0_i32_0 = arith.constant 0 : i32
    %c0_i32_1 = arith.constant 0 : i32
    return %c0_i32, %c0_i32_0 : i32, i32
  }
  func.func @transform_2(%arg0: i32) -> (i32, i32) {
    %c0_i32 = arith.constant 0 : i32
    %c0_i32_0 = arith.constant 0 : i32
    %c0_i32_1 = arith.constant 0 : i32
    return %c0_i32, %c0_i32_0 : i32, i32
  }
  func.func @transform_3(%arg0: i32) -> (i32, i32) {
    %c0_i32 = arith.constant 0 : i32
    %c0_i32_0 = arith.constant 0 : i32
    %c0_i32_1 = arith.constant 0 : i32
    return %c0_i32, %c0_i32_0 : i32, i32
  }
  func.func @transform_4(%arg0: i32) -> (i32, i32) {
    %c0_i32 = arith.constant 0 : i32
    %c0_i32_0 = arith.constant 0 : i32
    %c0_i32_1 = arith.constant 0 : i32
    return %c0_i32, %c0_i32_0 : i32, i32
  }
  func.func @transform_5(%arg0: i32) -> (i32, i32) {
    %c0_i32 = arith.constant 0 : i32
    %c0_i32_0 = arith.constant 0 : i32
    %c0_i32_1 = arith.constant 0 : i32
    return %c0_i32, %c0_i32_0 : i32, i32
  }
  func.func @transform_6(%arg0: i32) -> (i32, i32) {
    %c0_i32 = arith.constant 0 : i32
    %c0_i32_0 = arith.constant 0 : i32
    %c0_i32_1 = arith.constant 0 : i32
    return %c0_i32, %c0_i32_0 : i32, i32
  }
  func.func @transform_7(%arg0: i32) -> (i32, i32) {
    %c0_i32 = arith.constant 0 : i32
    %c0_i32_0 = arith.constant 0 : i32
    %c0_i32_1 = arith.constant 0 : i32
    return %c0_i32, %c0_i32_0 : i32, i32
  }
  func.func @transform_8(%arg0: i32) -> (i32, i32) {
    %c0_i32 = arith.constant 0 : i32
    %c0_i32_0 = arith.constant 0 : i32
    %c0_i32_1 = arith.constant 0 : i32
    return %c0_i32, %c0_i32_0 : i32, i32
  }
  func.func @transform_9(%arg0: i32) -> (i32, i32) {
    %c0_i32 = arith.constant 0 : i32
    %c0_i32_0 = arith.constant 0 : i32
    %c0_i32_1 = arith.constant 0 : i32
    return %c0_i32, %c0_i32_0 : i32, i32
  }
  func.func @transform_10(%arg0: i32) -> (i32, i32) {
    %c0_i32 = arith.constant 0 : i32
    %c0_i32_0 = arith.constant 0 : i32
    %c0_i32_1 = arith.constant 0 : i32
    return %c0_i32, %c0_i32_0 : i32, i32
  }
  func.func @transform_11(%arg0: i32) -> (i32, i32) {
    %c0_i32 = arith.constant 0 : i32
    %c0_i32_0 = arith.constant 0 : i32
    %c0_i32_1 = arith.constant 0 : i32
    return %c0_i32, %c0_i32_0 : i32, i32
  }
  func.func @transform_12(%arg0: i32) -> (i32, i32) {
    %c0_i32 = arith.constant 0 : i32
    %c0_i32_0 = arith.constant 0 : i32
    %c0_i32_1 = arith.constant 0 : i32
    return %c0_i32, %c0_i32_0 : i32, i32
  }
  func.func @transform_13(%arg0: i32) -> (i32, i32) {
    %c0_i32 = arith.constant 0 : i32
    %c0_i32_0 = arith.constant 0 : i32
    %c0_i32_1 = arith.constant 0 : i32
    return %c0_i32, %c0_i32_0 : i32, i32
  }
  func.func @transform_14(%arg0: i32) -> (i32, i32) {
    %c0_i32 = arith.constant 0 : i32
    %c0_i32_0 = arith.constant 0 : i32
    %c0_i32_1 = arith.constant 0 : i32
    return %c0_i32, %c0_i32_0 : i32, i32
  }
  func.func @transform_15(%arg0: i32) -> (i32, i32) {
    %c0_i32 = arith.constant 0 : i32
    %c0_i32_0 = arith.constant 0 : i32
    %c0_i32_1 = arith.constant 0 : i32
    return %c0_i32, %c0_i32_0 : i32, i32
  }
  func.func @transform_16(%arg0: i32) -> (i32, i32) {
    %c0_i32 = arith.constant 0 : i32
    %c0_i32_0 = arith.constant 0 : i32
    %c0_i32_1 = arith.constant 0 : i32
    return %c0_i32, %c0_i32_0 : i32, i32
  }
  func.func @transform_17(%arg0: i32) -> (i32, i32) {
    %c0_i32 = arith.constant 0 : i32
    %c0_i32_0 = arith.constant 0 : i32
    %c0_i32_1 = arith.constant 0 : i32
    return %c0_i32, %c0_i32_0 : i32, i32
  }
  func.func @transform_18(%arg0: i32) -> (i32, i32) {
    %c0_i32 = arith.constant 0 : i32
    %c0_i32_0 = arith.constant 0 : i32
    %c0_i32_1 = arith.constant 0 : i32
    return %c0_i32, %c0_i32_0 : i32, i32
  }
  func.func @transform_19(%arg0: i32) -> (i32, i32) {
    %c0_i32 = arith.constant 0 : i32
    %c0_i32_0 = arith.constant 0 : i32
    %c0_i32_1 = arith.constant 0 : i32
    return %c0_i32, %c0_i32_0 : i32, i32
  }
  func.func @transform_20(%arg0: i32) -> (i32, i32) {
    %c0_i32 = arith.constant 0 : i32
    %c0_i32_0 = arith.constant 0 : i32
    %c0_i32_1 = arith.constant 0 : i32
    return %c0_i32, %c0_i32_0 : i32, i32
  }
  func.func @transform_21(%arg0: i32) -> (i32, i32) {
    %c0_i32 = arith.constant 0 : i32
    %c0_i32_0 = arith.constant 0 : i32
    %c0_i32_1 = arith.constant 0 : i32
    return %c0_i32, %c0_i32_0 : i32, i32
  }
  func.func @transform_22(%arg0: i32) -> (i32, i32) {
    %c0_i32 = arith.constant 0 : i32
    %c0_i32_0 = arith.constant 0 : i32
    %c0_i32_1 = arith.constant 0 : i32
    return %c0_i32, %c0_i32_0 : i32, i32
  }
  func.func @transform_23(%arg0: i32) -> (i32, i32) {
    %c0_i32 = arith.constant 0 : i32
    %c0_i32_0 = arith.constant 0 : i32
    %c0_i32_1 = arith.constant 0 : i32
    return %c0_i32, %c0_i32_0 : i32, i32
  }
  func.func @transform_24(%arg0: i32) -> (i32, i32) {
    %c0_i32 = arith.constant 0 : i32
    %c0_i32_0 = arith.constant 0 : i32
    %c0_i32_1 = arith.constant 0 : i32
    return %c0_i32, %c0_i32_0 : i32, i32
  }
  func.func @transform_25(%arg0: i32) -> (i32, i32) {
    %c0_i32 = arith.constant 0 : i32
    %c0_i32_0 = arith.constant 0 : i32
    %c0_i32_1 = arith.constant 0 : i32
    return %c0_i32, %c0_i32_0 : i32, i32
  }
  func.func @transform_26(%arg0: i32) -> (i32, i32) {
    %c0_i32 = arith.constant 0 : i32
    %c0_i32_0 = arith.constant 0 : i32
    %c0_i32_1 = arith.constant 0 : i32
    return %c0_i32, %c0_i32_0 : i32, i32
  }
  func.func @transform_27(%arg0: i32) -> (i32, i32) {
    %c0_i32 = arith.constant 0 : i32
    %c0_i32_0 = arith.constant 0 : i32
    return %arg0, %c0_i32 : i32, i32
  }
}

</mosaic_0001>

<bundles_post_ra>
// kernel: forward.1
= control target key start
LH: loop header
LB: loop body
LE: loop exit
PB: predicated region body
PF: predicated region fallthrough
CT: control target
= control target key end

     0   :  { %s2853_s0 = inlined_call_operand.vmem [shape: bf16[32,256], index: 0, kind: input, shape index: {}]   ;;  %s2854_s1 = inlined_call_operand.vmem [shape: bf16[256,32], index: 1, kind: input, shape index: {}]   ;;  %s2855_s2 = inlined_call_operand.vmem [shape: f32[1,32], index: 2, kind: input, shape index: {}]   ;;  %s2856_s3 = inlined_call_operand.vmem [shape: f32[1,32], index: 3, kind: input, shape index: {}]   ;;  %s2857_s4 = inlined_call_operand.vmem [shape: f32[1,32], index: 4, kind: input, shape index: {}]   ;;  %s2858_s5 = inlined_call_operand.vmem [shape: bf16[32,128], index: 5, kind: input, shape index: {}]   ;;  %s2859_s6 = inlined_call_operand.vmem [shape: f32[1,128], index: 6, kind: input, shape index: {}]   ;;  %s2860_s7 = inlined_call_operand.vmem [shape: bf16[64,32], index: 7, kind: input, shape index: {}]   ;;  %s2861_s8 = inlined_call_operand.vmem [shape: f32[1,32], index: 8, kind: input, shape index: {}]   ;;  %s2862_s9 = inlined_call_operand.vmem [shape: bf16[128,64], index: 9, kind: input, shape index: {}]   ;;  %s2863_s10 = inlined_call_operand.vmem [shape: f32[1,64], index: 10, kind: input, shape index: {}]   ;;  %s2864_s11 = inlined_call_operand.vmem [shape: f32[1,64], index: 11, kind: input, shape index: {}]   ;;  %s2865_s12 = inlined_call_operand.vmem [shape: f32[1,64], index: 12, kind: input, shape index: {}]   ;;  %s2866_s13 = inlined_call_operand.vmem [shape: bf16[64,256], index: 13, kind: input, shape index: {}]   ;;  %s2867_s14 = inlined_call_operand.vmem [shape: f32[1,256], index: 14, kind: input, shape index: {}]   ;;  %s2868_s15 = inlined_call_operand.vmem [shape: bf16[128,64], index: 15, kind: input, shape index: {}]   ;;  %s2869_s16 = inlined_call_operand.vmem [shape: f32[1,64], index: 16, kind: input, shape index: {}]   ;;  %s2870_s17 = inlined_call_operand.vmem [shape: bf16[64,128], index: 17, kind: input, shape index: {}]   ;;  %s2871_s18 = inlined_call_operand.vmem [shape: f32[1,128], index: 18, kind: input, shape index: {}]   ;;  %s2872_s19 = inlined_call_operand.vmem [shape: f32[1,32], index: 19, kind: input, shape index: {}]   ;;  %s2873_s20 = inlined_call_operand.vmem [shape: f32[1,32], index: 20, kind: input, shape index: {}]   ;;  %s2874_s21 = inlined_call_operand.vmem [shape: bf16[32,128], index: 21, kind: input, shape index: {}]   ;;  %s2875_s22 = inlined_call_operand.vmem [shape: f32[1,128], index: 22, kind: input, shape index: {}]   ;;  %s2876_s23 = inlined_call_operand.vmem [shape: bf16[64,32], index: 23, kind: input, shape index: {}]   ;;  %s2877_s24 = inlined_call_operand.vmem [shape: f32[1,32], index: 24, kind: input, shape index: {}]   ;;  %s2878_s25 = inlined_call_operand.vmem [shape: bf16[32,128], index: 25, kind: input, shape index: {}]   ;;  %s2879_s26 = inlined_call_operand.vmem [shape: f32[1,128], index: 26, kind: input, shape index: {}]   ;;  %s2880_s27 = inlined_call_operand.vmem [shape: f32[32,128], index: 27, kind: output, shape index: {}]  }
   0x1   :  { %2889 = sst [smem:[#allocation3_spill]] %s2853_s0 }
   0x2   :  { %2890 = sst [smem:[#allocation4_spill]] %s2854_s1 }
   0x3   :  { %2891 = sst [smem:[#allocation5_spill]] %s2855_s2 }
   0x4   :  { %2892 = sst [smem:[#allocation6_spill]] %s2856_s3 }
   0x5   :  { %2893 = sst [smem:[#allocation7_spill]] %s2857_s4 }
   0x6   :  { %2894 = sst [smem:[#allocation8_spill]] %s2858_s5 }
   0x7   :  { %2895 = sst [smem:[#allocation9_spill]] %s2859_s6 }
   0x8   :  { %2896 = sst [smem:[#allocation10_spill]] %s2860_s7  ;;  %s2511_s7 = smov 0  }
   0x9   :  { %2897 = sst [smem:[#allocation11_spill]] %s2861_s8 }
   0xa   :  { %2898 = sst [smem:[#allocation12_spill]] %s2862_s9 }
   0xb   :  { %2899 = sst [smem:[#allocation13_spill]] %s2863_s10 }
   0xc   :  { %2900 = sst [smem:[#allocation14_spill]] %s2864_s11 }
   0xd LB: > { %2901 = sst [smem:[#allocation2_spill]] %s2364_s7  ;;  %s1961_s4 = sadd.s32 4294967295, %s2364_s7   ;;  %s2364_s7 = sphi %s2511_s7, %s37_s7  }
   0xe   : > { %p1965_p0 = scmp.ge.s32.totalorder %s2364_s7, 1  ;;  %p739_p1 = scmp.lt.s32.totalorder %s2364_s7, 3 }
  0x10   : > { %p740_p2 = pnand %p1965_p0, %p739_p1 }
  0x11   : > { %s2902_s9 = sld [smem:[#allocation4_spill]] (!%p740_p2)  ;;  %s1966_s8 = sshll.u32 (!%p740_p2), %s1961_s4, 1 }
  0x12   : > { %743 = sbr.rel (%p740_p2) target bundleno = 2686 (0xa7e), region = 128  ;;  %p813_p3 = scmp.lt.s32.totalorder (!%p740_p2), %s1966_s8, 3 }
  0x13   : > { %s2903_s1 = sld [smem:[#allocation3_spill]] (!%p740_p2)  ;;  %s2887_s11 = smov (!%p740_p2), 64  }
  0x14   : > { %s2904_s7 = sld [smem:[#allocation5_spill]] (!%p740_p2) }
  0x15   : > { %s2905_s29 = sld [smem:[#allocation8_spill]] (!%p740_p2) }
  0x16   : > { %s2906_s2 = sld [smem:[#allocation6_spill]] (!%p740_p2) }
  0x17   : > { %v2241_v0 = vld [vmem:[%s2902_s9 + $0x38] sm:$0xff]  ;;  %v2240_v2 = vld [vmem:[%s2902_s9 + $0x30] sm:$0xff]  ;;  %v2239_v4 = vld [vmem:[%s2902_s9 + $0x28] sm:$0xff]  ;;  %s2918_s8 = smov (!%p813_p3, %s1966_s8), 3  ;;  %vm1014_vm0 = vcmask 261120   ;;  %v2366_v33 = vmov 32.0  }
  0x18   : > { %v2249_v1 = vld [vmem:[%s2902_s9 + $0x78] sm:$0xff]  ;;  %970 = vmatpush.bf16.msra.mxu0 %v2241_v0  ;;  %v2248_v3 = vld [vmem:[%s2902_s9 + $0x70] sm:$0xff]  ;;  %v2247_v5 = vld [vmem:[%s2902_s9 + $0x68] sm:$0xff]  ;;  %s2886_s30 = sshll.u32 %s2918_s8, 3  ;;  %2320 = vrcp.f32 %v2366_v33  ;;  %s2907_s28 = sld [smem:[#allocation7_spill]] }
  0x19   : > { %984 = vmatpush.bf16.msra.mxu1 %v2249_v1  ;;  %v2238_v6 = vld [vmem:[%s2902_s9 + $0x20] sm:$0xff]  ;;  %v2237_v8 = vld [vmem:[%s2902_s9 + $0x18] sm:$0xff]  ;;  %v2236_v10 = vld [vmem:[%s2902_s9 + $0x10] sm:$0xff]  ;;  %s817_s6 = scalar_lea.vmem %s2903_s1, %s2886_s30  ;;  %s2908_s10 = sld [smem:[#allocation9_spill]] }
  0x1a   : > { %v2246_v7 = vld [vmem:[%s2902_s9 + $0x60] sm:$0xff]  ;;  %v2245_v9 = vld [vmem:[%s2902_s9 + $0x58] sm:$0xff]  ;;  %v2244_v11 = vld [vmem:[%s2902_s9 + $0x50] sm:$0xff]  ;;  %s2910_s1 = sld [smem:[#allocation12_spill]]  ;;  %s2914_s30 = smov 64  }
  0x1b   : > { %v2235_v12 = vld [vmem:[%s2902_s9 + $0x8] sm:$0xff]  ;;  %v2234_v14 = vld [vmem:[%s2902_s9] sm:$0xff]  ;;  %s2912_s4 = sld [smem:[#allocation13_spill]] }
  0x1c   : > { %971 = vmatpush.bf16.msra.mxu0 %v2240_v2  ;;  %v2243_v13 = vld [vmem:[%s2902_s9 + $0x48] sm:$0xff]  ;;  %v2242_v15 = vld [vmem:[%s2902_s9 + $0x40] sm:$0xff] }
  0x1d   : > { %985 = vmatpush.bf16.msra.mxu1 %v2248_v3  ;;  %v1973_v16 = vld [vmem:[%s817_s6] sm:$0xf]  ;;  %v2233_v17 = vld [vmem:[%s817_s6 + $0x4] sm:$0xf0]  ;;  %v2232_v18 = vld [vmem:[%s817_s6 + $0x4] sm:$0xf] }
  0x1e   : > { %v1975_v19 = vld [vmem:[%s817_s6 + $0x8] sm:$0xf0]  ;;  %v1974_v20 = vor.u32 %v2233_v17, %v1973_v16  ;;  %v2305_v22 = vld [vmem:[%s2904_s7] ss:$0 sm:$0xff]  ;;  %v2321_v34 = vpop.eup %2320  ;;  %s2909_s6 = sld [smem:[#allocation10_spill]] }
  0x1f   : > { %v1978_v21 = vor.u32 %v2232_v18, %v1975_v19  ;;  %v1022_v35 = vmul.f32 32.0, %v2321_v34  ;;  %vm1026_vm1 = vweird.f32 %v2321_v34  ;;  %v2251_v50 = vld [vmem:[%s2905_s29 + $0x8] sm:$0xff]  ;;  %v2250_v52 = vld [vmem:[%s2905_s29] sm:$0xff]  ;;  %s2913_s7 = sld [smem:[#allocation14_spill]] }
  0x20   : > { %972 = vmatpush.bf16.msra.mxu0 %v2239_v4  ;;  %1101 = vmatpush.bf16.msra.mxu2 %v2251_v50  ;;  %v2308_v17 = vld [vmem:[%s2908_s10] ss:$0 sm:$0xff]  ;;  %s2911_s10 = sld [smem:[#allocation11_spill]] }
  0x21   : > { %986 = vmatpush.bf16.msra.mxu1 %v2247_v5  ;;  %v1023_v36 = vsub.f32 1.0, %v1022_v35 }
  0x23   : > { %v1024_v37 = vmul.f32 %v2321_v34, %v1023_v36 }
  0x24   : > { %973 = vmatpush.bf16.msra.mxu0 %v2238_v6  ;;  %1102 = vmatpush.bf16.msra.mxu2 %v2250_v52 }
  0x25   : > { %987 = vmatpush.bf16.msra.mxu1 %v2246_v7  ;;  %v1025_v38 = vadd.f32 %v2321_v34, %v1024_v37  ;;  %v2306_v7 = vld [vmem:[%s2906_s2] ss:$0 sm:$0xff] }
  0x27   : > { %v2586_v39 = vsel %vm1026_vm1, %v2321_v34, %v1025_v38  ;;  %vm1187_vm1 = vcmask 523264  }
  0x28   : > { %974 = vmatpush.bf16.msra.mxu0 %v2237_v8 }
  0x29   : > { %988 = vmatpush.bf16.msra.mxu1 %v2245_v9 }
  0x2c   : > { %975 = vmatpush.bf16.msra.mxu0 %v2236_v10 }
  0x2d   : > { %989 = vmatpush.bf16.msra.mxu1 %v2244_v11 }
  0x30   : > { %976 = vmatpush.bf16.msra.mxu0 %v2235_v12  ;;  %v2307_v12 = vld [vmem:[%s2907_s28] ss:$0 sm:$0xff] }
  0x31   : > { %990 = vmatpush.bf16.msra.mxu1 %v2243_v13 }
  0x34   : > { %977 = vmatpush.bf16.msra.mxu0 %v2234_v14 }
  0x35   : > { %991 = vmatpush.bf16.msra.mxu1 %v2242_v15 }
  0x37   : > { %978 = vmatmul.bf16.vlgmr.msra.gmra.mxu0 %v1974_v20 }
  0x38   : > { %992 = vmatmul.bf16.vlgmr.msra.gmra.mxu1 %v1978_v21 }
  0xb4   : > { %v979_v23 = vpop.f32.mrf.mxu0 }
  0xb5   : > { %v993_v24 = vpop.f32.mrf.mxu1  ;;  %v980_v25 = vadd.f32 %v2305_v22, %v979_v23  ;;  %v2255_v23 = vld [vmem:[%s2909_s6 + $0x18] sm:$0xff] }
  0xb6   : > { %1195 = vmatpush.bf16.msra.mxu3 %v2255_v23 }
  0xb7   : > { %v2578_v26 = vadd.f32 %v993_v24, %v980_v25 }
  0xb9   : > { %v1015_v27 = vsel %vm1014_vm0, %v2578_v26, 0.0 }
  0xba   : > { %1016 = vadd.xlane.f32.xlu0 %v1015_v27 }
  0xbc   : > { %v981_v28 = vpop.f32.mrf.mxu0 }
  0xbd   : > { %v982_v29 = vadd.f32 %v2305_v22, %v981_v28  ;;  %v995_v30 = vpop.f32.mrf.mxu1 }
  0xbf   : > { %v2582_v31 = vadd.f32 %v995_v30, %v982_v29 }
  0xc1   : > { %v1018_v32 = vsel %vm1014_vm0, %v2582_v31, 0.0 }
  0xc2   : > { %1019 = vadd.xlane.f32.xlu0 %v1018_v32 }
 0x12d   : > { %v1017_v40 = vpop.xlane.xlu0 %1016 }
 0x12e   : > { %v1028_v41 = vmul.f32 %v2586_v39, %v1017_v40 }
 0x130   : > { %v1030_v42 = vsub.f32 %v2578_v26, %v1028_v41 }
 0x132   : > { %v1032_v43 = vmul.f32 %v1030_v42, %v1030_v42 }
 0x134   : > { %v1034_v44 = vsel %vm1014_vm0, %v1032_v43, 0.0 }
 0x135   : > { %1035 = vadd.xlane.f32.xlu1 %v1034_v44  ;;  %v1020_v45 = vpop.xlane.xlu0 %1019 }
 0x136   : > { %v1029_v46 = vmul.f32 %v2586_v39, %v1020_v45 }
 0x138   : > { %v1031_v47 = vsub.f32 %v2582_v31, %v1029_v46 }
 0x13a   : > { %v1033_v48 = vmul.f32 %v1031_v47, %v1031_v47 }
 0x13c   : > { %v1037_v49 = vsel %vm1014_vm0, %v1033_v48, 0.0 }
 0x13d   : > { %1038 = vadd.xlane.f32.xlu1 %v1037_v49 }
 0x1a8   : > { %v1036_v51 = vpop.xlane.xlu1 %1035 }
 0x1a9   : > { %v1040_v53 = vmul.f32 %v1036_v51, %v2586_v39 }
 0x1ab   : > { %v1042_v54 = vadd.f32 1e-05, %v1040_v53 }
 0x1ad   : > { %2322 = vrsqrt.f32 %v1042_v54  ;;  %vm1050_vm3 = vweird.f32 %v1042_v54 }
 0x1b0   : > { %v1039_v55 = vpop.xlane.xlu1 %1038 }
 0x1b1   : > { %v1041_v56 = vmul.f32 %v1039_v55, %v2586_v39  ;;  %v2253_v55 = vld [vmem:[%s2909_s6 + $0x8] sm:$0xff] }
 0x1b3   : > { %v2323_v57 = vpop.eup %2322  ;;  %v1043_v58 = vadd.f32 1e-05, %v1041_v56  ;;  %v2252_v56 = vld [vmem:[%s2909_s6] sm:$0xff] }
 0x1b4   : > { %v1045_v59 = vmul.f32 %v2323_v57, %v1042_v54  ;;  %vm1051_vm2 = vweird.f32 %v2323_v57  ;;  %v2254_v54 = vld [vmem:[%s2909_s6 + $0x10] sm:$0xff] }
 0x1b5   : > { %2324 = vrsqrt.f32 %v1043_v58  ;;  %vm1052_vm4 = vmor %vm1050_vm3, %vm1051_vm2  ;;  %vm1060_vm6 = vweird.f32 %v1043_v58  ;;  %1196 = vmatpush.bf16.msra.mxu3 %v2254_v54  ;;  %vm1376_vm2 = vcmask 519168   ;;  %v2269_v54 = vld [vmem:[%s2866_s13 + $0x24] sm:$0xf0] }
 0x1b6   : > { %v1046_v60 = vmul.f32 %v2323_v57, %v1045_v59 }
 0x1b8   : > { %v1047_v61 = vmul.f32 0.5, %v1046_v60 }
 0x1b9   : > { %1197 = vmatpush.bf16.msra.mxu3 %v2253_v55 }
 0x1ba   : > { %v1048_v62 = vsub.f32 1.5, %v1047_v61 }
 0x1bb   : > { %v2325_v63 = vpop.eup %2324 }
 0x1bc   : > { %v1049_v0 = vmul.f32 %v2323_v57, %v1048_v62  ;;  %v1055_v1 = vmul.f32 %v2325_v63, %v1043_v58  ;;  %vm1061_vm5 = vweird.f32 %v2325_v63 }
 0x1bd   : > { %vm1062_vm7 = vmor %vm1060_vm6, %vm1061_vm5  ;;  %1198 = vmatpush.bf16.msra.mxu3 %v2252_v56  ;;  %v2266_v56 = vld [vmem:[%s2866_s13 + $0x14] sm:$0xf] }
 0x1be   : > { %v1056_v2 = vmul.f32 %v2325_v63, %v1055_v1  ;;  %v1053_v3 = vsel %vm1052_vm4, %v2323_v57, %v1049_v0  ;;  %v2259_v57 = vld [vmem:[%s2910_s1 + $0x18] sm:$0xff]  ;;  %v2256_v0 = vld [vmem:[%s2910_s1] sm:$0xff]  ;;  %v2258_v1 = vld [vmem:[%s2910_s1 + $0x10] sm:$0xff] }
 0x1bf   : > { %v1064_v6 = vmul.f32 %v1053_v3, %v1030_v42  ;;  %1247 = vmatpush.bf16.msrb.mxu2 %v2259_v57  ;;  %v2262_v3 = vld [vmem:[%s2910_s1 + $0x30] sm:$0xff]  ;;  %v2119_v57 = vld [vmem:[%s2866_s13 + $0x18] sm:$0xf0] }
 0x1c0   : > { %v1057_v4 = vmul.f32 0.5, %v1056_v2  ;;  %v2263_v2 = vld [vmem:[%s2910_s1 + $0x38] sm:$0xff] }
 0x1c1   : > { %v1069_v11 = vmul.f32 %v2306_v7, %v1064_v6  ;;  %1335 = vmatpush.bf16.msrb.mxu0 %v2263_v2  ;;  %v2309_v6 = vld [vmem:[%s2911_s10] ss:$0 sm:$0xff]  ;;  %v2265_v2 = vld [vmem:[%s2866_s13 + $0x4] sm:$0xf0] }
 0x1c2   : > { %v1058_v5 = vsub.f32 1.5, %v1057_v4  ;;  %v2261_v4 = vld [vmem:[%s2910_s1 + $0x28] sm:$0xff] }
 0x1c3   : > { %v1074_v14 = vadd.f32 %v2307_v12, %v1069_v11  ;;  %1248 = vmatpush.bf16.msrb.mxu2 %v2258_v1 }
 0x1c4   : > { %v1059_v8 = vmul.f32 %v2325_v63, %v1058_v5  ;;  %v2260_v5 = vld [vmem:[%s2910_s1 + $0x20] sm:$0xff] }
 0x1c5   : > { %1336 = vmatpush.bf16.msrb.mxu0 %v2262_v3 }
 0x1c6   : > { %v1063_v9 = vsel %vm1062_vm7, %v2325_v63, %v1059_v8  ;;  %v2257_v63 = vld [vmem:[%s2910_s1 + $0x8] sm:$0xff] }
 0x1c7   : > { %v1065_v10 = vmul.f32 %v1063_v9, %v1031_v47  ;;  %1275 = vmatpush.bf16.msrb.mxu3 %v2257_v63  ;;  %v2111_v63 = vld [vmem:[%s2866_s13 + $0x8] sm:$0xf0] }
 0x1c9   : > { %v1070_v13 = vmul.f32 %v2306_v7, %v1065_v10 }
 0x1cb   : > { %v1075_v15 = vadd.f32 %v2307_v12, %v1070_v13  ;;  %1276 = vmatpush.bf16.msrb.mxu3 %v2256_v0  ;;  %v2109_v0 = vld [vmem:[%s2866_s13] sm:$0xf] }
 0x1cc   : > { %v2110_v3 = vor.u32 %v2265_v2, %v2109_v0 }
 0x1cd   : > { %v1076_v16 = vpack.c.bf16 %v1075_v15, %v1074_v14 }
 0x1cf   : > { %2051 = vmatmul.msk.bf16.vlgmr.msra.gmra.mxu2 %vm1014_vm0, %v1076_v16 }
 0x1d0   : > { %1304 = vmatpush.bf16.msra.mxu2 %v2261_v4 }
 0x1d4   : > { %1305 = vmatpush.bf16.msra.mxu2 %v2260_v5 }
 0x252   : > { %v1104_v18 = vpop.f32.mrf.mxu2 }
 0x253   : > { %v1105_v19 = vadd.f32 %v2308_v17, %v1104_v18 }
 0x255   : > { %v2052_v20 = vmul.f32 -1.442695, %v1105_v19 }
 0x257   : > { %2326 = vpow2.f32 %v2052_v20 }
 0x25a   : > { %v1106_v21 = vpop.f32.mrf.mxu2 }
 0x25b   : > { %v1107_v22 = vadd.f32 %v2308_v17, %v1106_v21 }
 0x25d   : > { %v2327_v24 = vpop.eup %2326  ;;  %v2053_v25 = vmul.f32 -1.442695, %v1107_v22 }
 0x25e   : > { %v1115_v27 = vadd.f32 1.0, %v2327_v24 }
 0x25f   : > { %2328 = vpow2.f32 %v2053_v25 }
 0x260   : > { %2330 = vrcp.f32 %v1115_v27  ;;  %v1128_v34 = vand.u32 2147483648, %v1115_v27  ;;  %v1126_v36 = vand.u32 2147483647, %v1115_v27  ;;  %vm1122_vm9 = vweird.f32 %v1115_v27 }
 0x262   : > { %v1129_v40 = vor.u32 1.1754944e-38, %v1128_v34  ;;  %vm1127_vm11 = vcmp.eq.f32.partialorder %v1126_v36, 8.507059e+37 }
 0x265   : > { %v2329_v28 = vpop.eup %2328 }
 0x266   : > { %v2331_v29 = vpop.eup %2330  ;;  %v1116_v30 = vadd.f32 1.0, %v2329_v28 }
 0x267   : > { %v1118_v32 = vmul.f32 %v2331_v29, %v1115_v27  ;;  %vm1123_vm8 = vweird.f32 %v2331_v29 }
 0x268   : > { %2332 = vrcp.f32 %v1116_v30  ;;  %vm1124_vm10 = vmor %vm1122_vm9, %vm1123_vm8  ;;  %v1143_v46 = vand.u32 2147483648, %v1116_v30  ;;  %v1141_v48 = vand.u32 2147483647, %v1116_v30  ;;  %vm1137_vm13 = vweird.f32 %v1116_v30 }
 0x269   : > { %v1119_v33 = vsub.f32 1.0, %v1118_v32 }
 0x26a   : > { %v1144_v50 = vor.u32 1.1754944e-38, %v1143_v46  ;;  %vm1142_vm15 = vcmp.eq.f32.partialorder %v1141_v48, 8.507059e+37  ;;  %v2133_v46 = vld [vmem:[%s2866_s13 + $0x30] sm:$0xf]  ;;  %v2271_v48 = vld [vmem:[%s2866_s13 + $0x34] sm:$0xf0] }
 0x26b   : > { %v1120_v35 = vmul.f32 %v2331_v29, %v1119_v33 }
 0x26d   : > { %v1121_v37 = vadd.f32 %v2331_v29, %v1120_v35 }
 0x26e   : > { %v2333_v38 = vpop.eup %2332 }
 0x26f   : > { %v1133_v41 = vmul.f32 %v2333_v38, %v1116_v30  ;;  %v1125_v42 = vsel %vm1124_vm10, %v2331_v29, %v1121_v37  ;;  %vm1138_vm12 = vweird.f32 %v2333_v38  ;;  %v2368_v30 = vmov 64.0  }
 0x270   : > { %v1130_v43 = vsel %vm1127_vm11, %v1129_v40, %v1125_v42  ;;  %vm1139_vm14 = vmor %vm1137_vm13, %vm1138_vm12  ;;  %2334 = vrcp.f32 %v2368_v30 }
 0x271   : > { %v1134_v44 = vsub.f32 1.0, %v1133_v41  ;;  %v1147_v45 = vmul.f32 %v1130_v43, %v1105_v19 }
 0x273   : > { %v1135_v47 = vmul.f32 %v2333_v38, %v1134_v44  ;;  %1151 = vrot.lane.b32.xlu2 %v1147_v45, %s2887_s11  ;;  %v2270_v44 = vld [vmem:[%s2866_s13 + $0x34] sm:$0xf] }
 0x275   : > { %v1136_v49 = vadd.f32 %v2333_v38, %v1135_v47 }
 0x276   : > { %v2335_v32 = vpop.eup %2334 }
 0x277   : > { %v1140_v51 = vsel %vm1139_vm14, %v2333_v38, %v1136_v49  ;;  %v1381_v33 = vmul.f32 64.0, %v2335_v32  ;;  %vm1385_vm3 = vweird.f32 %v2335_v32  ;;  %v2134_v49 = vor.u32 %v2271_v48, %v2133_v46  ;;  %v2281_v48 = vld [vmem:[%s2870_s17 + $0x8] sm:$0xff] }
 0x278   : > { %v1145_v52 = vsel %vm1142_vm15, %v1144_v50, %v1140_v51  ;;  %v2268_v50 = vld [vmem:[%s2866_s13 + $0x24] sm:$0xf]  ;;  %v2127_v51 = vld [vmem:[%s2866_s13 + $0x28] sm:$0xf0]  ;;  %vm1660_vm15 = vcmask 1043456  }
 0x279   : > { %v1148_v53 = vmul.f32 %v1145_v52, %v1107_v22  ;;  %v1382_v34 = vsub.f32 1.0, %v1381_v33  ;;  %1467 = vmatpush.bf16.msrb.mxu1 %v2134_v49  ;;  %v2125_v52 = vld [vmem:[%s2866_s13 + $0x20] sm:$0xf]  ;;  %v2273_v33 = vld [vmem:[%s2868_s15 + $0x8] sm:$0xff] }
 0x27a   : > { %v2126_v55 = vor.u32 %v2269_v54, %v2125_v52 }
 0x27b   : > { %1153 = vrot.lane.b32.xlu2 %v1148_v53, %s2887_s11  ;;  %v1383_v35 = vmul.f32 %v2335_v32, %v1382_v34  ;;  %s2369_s11 = smov 32  }
 0x27d   : > { %v1384_v36 = vadd.f32 %v2335_v32, %v1383_v35  ;;  %1468 = vmatpush.bf16.msrb.mxu1 %v2126_v55 }
 0x27f   : > { %v1386_v37 = vsel %vm1385_vm3, %v2335_v32, %v1384_v36 }
 0x2cd   : > { %v1152_v58 = vpop.permute.xlu2 %1151 }
 0x2ce   : > { %v1157_v60 = vmul.f32 %v1152_v58, %v1147_v45  ;;  %v2135_v45 = vld [vmem:[%s2866_s13 + $0x38] sm:$0xf0]  ;;  %v2117_v58 = vld [vmem:[%s2866_s13 + $0x10] sm:$0xf] }
 0x2cf   : > { %v2138_v47 = vor.u32 %v2270_v44, %v2135_v45  ;;  %v2282_v45 = vld [vmem:[%s2870_s17 + $0x10] sm:$0xff] }
 0x2d5   : > { %v1154_v59 = vpop.permute.xlu2 %1153 }
 0x2d6   : > { %v1158_v61 = vmul.f32 %v1154_v59, %v1148_v53  ;;  %v2130_v53 = vor.u32 %v2268_v50, %v2127_v51  ;;  %v2122_v59 = vor.u32 %v2266_v56, %v2119_v57 }
 0x2d8   : > { %v1159_v62 = vpack.c.bf16 %v1158_v61, %v1157_v60  ;;  %v2267_v60 = vld [vmem:[%s2866_s13 + $0x14] sm:$0xf0] }
 0x2d9   : > { %v2118_v61 = vor.u32 %v2267_v60, %v2117_v58 }
 0x2da   : > { %2070 = vmatmul.msk.bf16.vlgmr.msra.gmra.mxu3 %vm1187_vm1, %v1159_v62  ;;  %v2264_v62 = vld [vmem:[%s2866_s13 + $0x4] sm:$0xf] }
 0x2db   : > { %1480 = vmatpush.bf16.msra.mxu3 %v2138_v47  ;;  %v2114_v1 = vor.u32 %v2264_v62, %v2111_v63  ;;  %1469 = vmatpush.bf16.msrb.mxu1 %v2118_v61 }
 0x2df   : > { %1481 = vmatpush.bf16.msra.mxu3 %v2130_v53  ;;  %1470 = vmatpush.bf16.msrb.mxu1 %v2110_v3 }
 0x2e3   : > { %1482 = vmatpush.bf16.msra.mxu3 %v2122_v59 }
 0x2e7   : > { %1483 = vmatpush.bf16.msra.mxu3 %v2114_v1 }
 0x35d   : > { %v1200_v7 = vpop.f32.mrf.mxu3 }
 0x35e   : > { %v1201_v8 = vadd.f32 %v2309_v6, %v1200_v7 }
 0x360   : > { %v2655_v9 = vadd.f32 %v1201_v8, %v2578_v26 }
 0x362   : > { %v1223_v10 = vpack.c.bf16 %v2655_v9, %v2655_v9 }
 0x364   : > { %v1225_v11 = vrot.slane %v1223_v10, 2  ;;  %2088 = vmatmul.msk.bf16.vlgmr.msrb.gmra.mxu3 %vm1014_vm0, %v1223_v10 }
 0x365   : > { %v1202_v12 = vpop.f32.mrf.mxu3 }
 0x366   : > { %v1203_v13 = vadd.f32 %v2309_v6, %v1202_v12  ;;  %2079 = vmatmul.msk.bf16.vlgmr.msrb.gmra.mxu2 %vm1014_vm0, %v1225_v11 }
 0x368   : > { %v2662_v14 = vadd.f32 %v1203_v13, %v2582_v31  ;;  %v2310_v31 = vld [vmem:[%s2912_s4] ss:$0 sm:$0xff]  ;;  %s2370_s4 = smov 96  }
 0x36a   : > { %v1282_v15 = vpack.c.bf16 %v2662_v14, %v2662_v14 }
 0x36c   : > { %v1313_v16 = vrot.slane %v1282_v15, 2 }
 0x36e   : > { %2106 = vmatmul.msk.bf16.vlgmr.msrb.gmra.mxu0 %vm1014_vm0, %v1313_v16 }
 0x376   : > { %2097 = vmatmul.msk.bf16.vlgmr.msra.gmra.mxu2 %vm1014_vm0, %v1282_v15  ;;  %v2311_v15 = vld [vmem:[%s2913_s7] ss:$0 sm:$0xff] }
 0x3e7   : > { %v1278_v26 = vpop.f32.mrf.mxu3 }
 0x3e9   : > { %v1250_v17 = vpop.f32.mrf.mxu2 }
 0x3ea   : > { %v1279_v22 = vadd.f32 %v1278_v26, %v1250_v17  ;;  %v2312_v17 = vld [vmem:[%s2865_s12] ss:$0 sm:$0xff] }
 0x3eb   : > { %v1338_v18 = vpop.f32.mrf.mxu0 }
 0x3ef   : > { %v1280_v19 = vpop.f32.mrf.mxu3 }
 0x3f1   : > { %v1252_v20 = vpop.f32.mrf.mxu2 }
 0x3f3   : > { %v1340_v21 = vpop.f32.mrf.mxu0 }
 0x3f4   : > { %v2279_v21 = vld [vmem:[%s2868_s15 + $0x38] sm:$0xff] }
 0x3f5   : > { %1582 = vmatpush.bf16.msrb.mxu2 %v2279_v21 }
 0x3f9   : > { %v1307_v23 = vpop.f32.mrf.mxu2 }
 0x3fa   : > { %v1311_v24 = vadd.f32 %v1307_v23, %v1279_v22  ;;  %v2278_v22 = vld [vmem:[%s2868_s15 + $0x30] sm:$0xff]  ;;  %v2277_v23 = vld [vmem:[%s2868_s15 + $0x28] sm:$0xff] }
 0x3fb   : > { %1583 = vmatpush.bf16.msrb.mxu2 %v2278_v22 }
 0x3fc   : > { %v1342_v25 = vadd.f32 %v1338_v18, %v1311_v24  ;;  %v2276_v24 = vld [vmem:[%s2868_s15 + $0x20] sm:$0xff] }
 0x3fe   : > { %v2671_v27 = vadd.f32 %v2310_v31, %v1342_v25  ;;  %v1358_v31 = vld [vmem:[%s2867_s14] sm:$0x3]  ;;  %v2275_v25 = vld [vmem:[%s2868_s15 + $0x18] sm:$0xff] }
 0x3ff   : > { %1584 = vmatpush.bf16.msrb.mxu2 %v2277_v23  ;;  %v1417_v35 = vperm.slane %v1358_v31, 1 }
 0x400   : > { %v1377_v28 = vsel %vm1376_vm2, %v2671_v27, 0.0 }
 0x401   : > { %1378 = vadd.xlane.f32.xlu0 %v1377_v28  ;;  %v1309_v29 = vpop.f32.mrf.mxu2  ;;  %v1416_v28 = vperm.slane %v1358_v31, 0 }
 0x402   : > { %v2274_v29 = vld [vmem:[%s2868_s15 + $0x10] sm:$0xff] }
 0x403   : > { %1585 = vmatpush.bf16.msrb.mxu2 %v2276_v24 }
 0x407   : > { %1586 = vmatpush.bf16.msrb.mxu2 %v2275_v25 }
 0x40b   : > { %1587 = vmatpush.bf16.msrb.mxu2 %v2274_v29 }
 0x40f   : > { %1588 = vmatpush.bf16.msrb.mxu2 %v2273_v33 }
 0x474   : > { %v1379_v38 = vpop.xlane.xlu0 %1378 }
 0x475   : > { %v1387_v40 = vmul.f32 %v1386_v37, %v1379_v38 }
 0x477   : > { %v1388_v41 = vsub.f32 %v2671_v27, %v1387_v40 }
 0x479   : > { %v1389_v42 = vmul.f32 %v1388_v41, %v1388_v41 }
 0x47b   : > { %v1390_v43 = vsel %vm1376_vm2, %v1389_v42, 0.0 }
 0x47c   : > { %1391 = vadd.xlane.f32.xlu1 %v1390_v43  ;;  %v2283_v43 = vld [vmem:[%s2870_s17 + $0x18] sm:$0xff] }
 0x47d   : > { %1640 = vmatpush.bf16.msra.mxu0 %v2283_v43 }
 0x481   : > { %1641 = vmatpush.bf16.msra.mxu0 %v2282_v45  ;;  %v2285_v45 = vld [vmem:[%s2874_s21 + $0x8] sm:$0xff] }
 0x482   : > { %1760 = vmatpush.bf16.msra.mxu1 %v2285_v45  ;;  %v2288_v45 = vld [vmem:[%s2876_s23 + $0x10] sm:$0xff] }
 0x485   : > { %1642 = vmatpush.bf16.msra.mxu0 %v2281_v48 }
 0x4ef   : > { %v1392_v4 = vpop.xlane.xlu1 %1391 }
 0x4f0   : > { %v1393_v5 = vmul.f32 %v1392_v4, %v1386_v37  ;;  %v2272_v37 = vld [vmem:[%s2868_s15] sm:$0xff] }
 0x4f1   : > { %1589 = vmatpush.bf16.msrb.mxu2 %v2272_v37 }
 0x4f2   : > { %v1394_v6 = vadd.f32 1e-05, %v1393_v5 }
 0x4f4   : > { %2336 = vrsqrt.f32 %v1394_v6  ;;  %vm1401_vm5 = vweird.f32 %v1394_v6 }
 0x4fa   : > { %v2337_v7 = vpop.eup %2336 }
 0x4fb   : > { %v1396_v8 = vmul.f32 %v2337_v7, %v1394_v6  ;;  %vm1402_vm4 = vweird.f32 %v2337_v7 }
 0x4fc   : > { %vm1403_vm6 = vmor %vm1401_vm5, %vm1402_vm4 }
 0x4fd   : > { %v1397_v10 = vmul.f32 %v2337_v7, %v1396_v8 }
 0x4ff   : > { %v1398_v11 = vmul.f32 0.5, %v1397_v10 }
 0x501   : > { %v1399_v12 = vsub.f32 1.5, %v1398_v11  ;;  %v2280_v11 = vld [vmem:[%s2870_s17] sm:$0xff] }
 0x502   : > { %1643 = vmatpush.bf16.msra.mxu0 %v2280_v11 }
 0x503   : > { %v1400_v13 = vmul.f32 %v2337_v7, %v1399_v12  ;;  %v2313_v12 = vld [vmem:[%s2869_s16] ss:$0 sm:$0xff] }
 0x505   : > { %v1404_v16 = vsel %vm1403_vm6, %v2337_v7, %v1400_v13 }
 0x506   : > { %v1405_v26 = vmul.f32 %v1404_v16, %v1388_v41 }
 0x508   : > { %v1409_v18 = vmul.f32 %v2311_v15, %v1405_v26 }
 0x50a   : > { %v1413_v19 = vadd.f32 %v2312_v17, %v1409_v18  ;;  %v2314_v18 = vld [vmem:[%s2871_s18] ss:$0 sm:$0xff] }
 0x50c   : > { %v1414_v20 = vpack.c.bf16 %v1413_v19, %v1413_v19 }
 0x50e   : > { %2139 = vmatmul.msk.bf16.vlgmr.msrb.gmra.mxu1 %vm1187_vm1, %v1414_v20  ;;  %2140 = vmatmul.msk.bf16.vlgmr.msra.gmra.mxu3 %vm1187_vm1, %v1414_v20 }
 0x58b   : > { %v1472_v30 = vpop.f32.mrf.mxu1 }
 0x58c   : > { %v1473_v32 = vadd.f32 %v1472_v30, %v1416_v28 }
 0x58e   : > { %v2141_v34 = vmul.f32 -1.442695, %v1473_v32 }
 0x590   : > { %2338 = vpow2.f32 %v2141_v34 }
 0x591   : > { %v1485_v36 = vpop.f32.mrf.mxu3 }
 0x592   : > { %v1486_v38 = vadd.f32 %v1485_v36, %v1417_v35 }
 0x593   : > { %v1474_v40 = vpop.f32.mrf.mxu1 }
 0x594   : > { %v2142_v41 = vmul.f32 -1.442695, %v1486_v38 }
 0x596   : > { %v2339_v42 = vpop.eup %2338  ;;  %2340 = vpow2.f32 %v2142_v41 }
 0x597   : > { %v1492_v44 = vadd.f32 1.0, %v2339_v42 }
 0x599   : > { %2342 = vrcp.f32 %v1492_v44  ;;  %v1487_v46 = vpop.f32.mrf.mxu3  ;;  %v1504_v57 = vand.u32 2147483648, %v1492_v44  ;;  %vm1498_vm8 = vweird.f32 %v1492_v44  ;;  %v1502_v58 = vand.u32 2147483647, %v1492_v44 }
 0x59b   : > { %v1505_v0 = vor.u32 1.1754944e-38, %v1504_v57  ;;  %vm1503_vm11 = vcmp.eq.f32.partialorder %v1502_v58, 8.507059e+37 }
 0x59c   : > { %v2341_v47 = vpop.eup %2340 }
 0x59d   : > { %v1512_v49 = vadd.f32 1.0, %v2341_v47  ;;  %v2284_v47 = vld [vmem:[%s2874_s21] sm:$0xff] }
 0x59e   : > { %1761 = vmatpush.bf16.msra.mxu1 %v2284_v47  ;;  %v2286_v47 = vld [vmem:[%s2876_s23] sm:$0xff] }
 0x59f   : > { %v2343_v50 = vpop.eup %2342  ;;  %2344 = vrcp.f32 %v1512_v49  ;;  %v1524_v60 = vand.u32 2147483648, %v1512_v49  ;;  %v1522_v63 = vand.u32 2147483647, %v1512_v49  ;;  %vm1518_vm12 = vweird.f32 %v1512_v49 }
 0x5a0   : > { %v1494_v51 = vmul.f32 %v2343_v50, %v1492_v44  ;;  %vm1499_vm7 = vweird.f32 %v2343_v50 }
 0x5a1   : > { %vm1500_vm9 = vmor %vm1498_vm8, %vm1499_vm7  ;;  %v1525_v3 = vor.u32 1.1754944e-38, %v1524_v60  ;;  %vm1523_vm14 = vcmp.eq.f32.partialorder %v1522_v63, 8.507059e+37 }
 0x5a2   : > { %v1495_v52 = vsub.f32 1.0, %v1494_v51 }
 0x5a4   : > { %v1496_v53 = vmul.f32 %v2343_v50, %v1495_v52 }
 0x5a5   : > { %v2345_v54 = vpop.eup %2344 }
 0x5a6   : > { %v1497_v55 = vadd.f32 %v2343_v50, %v1496_v53  ;;  %v1514_v56 = vmul.f32 %v2345_v54, %v1512_v49  ;;  %vm1519_vm10 = vweird.f32 %v2345_v54 }
 0x5a7   : > { %vm1520_vm13 = vmor %vm1518_vm12, %vm1519_vm10 }
 0x5a8   : > { %v1515_v59 = vsub.f32 1.0, %v1514_v56  ;;  %v1501_v61 = vsel %vm1500_vm9, %v2343_v50, %v1497_v55 }
 0x5a9   : > { %v1506_v2 = vsel %vm1503_vm11, %v1505_v0, %v1501_v61 }
 0x5aa   : > { %v1516_v62 = vmul.f32 %v2345_v54, %v1515_v59  ;;  %v1508_v6 = vmul.f32 %v1506_v2, %v1473_v32 }
 0x5ac   : > { %v1517_v1 = vadd.f32 %v2345_v54, %v1516_v62  ;;  %v2315_v62 = vld [vmem:[%s2872_s19] ss:$0 sm:$0xff] }
 0x5ae   : > { %v1521_v4 = vsel %vm1520_vm13, %v2345_v54, %v1517_v1  ;;  %v2316_v1 = vld [vmem:[%s2873_s20] ss:$0 sm:$0xff] }
 0x5af   : > { %v1526_v5 = vsel %vm1523_vm14, %v1525_v3, %v1521_v4 }
 0x5b0   : > { %v1528_v7 = vmul.f32 %v1526_v5, %v1486_v38 }
 0x5b2   : > { %v1529_v8 = vmul.f32 %v1528_v7, %v1508_v6 }
 0x5b4   : > { %v1530_v10 = vpack.c.bf16 %v1529_v8, %v1529_v8  ;;  %v2317_v8 = vld [vmem:[%s2875_s22] ss:$0 sm:$0xff] }
 0x5b6   : > { %1590 = vmatmul.bf16.vlgmr.msrb.gmra.mxu2 %v1530_v10 }
 0x639   : > { %v1591_v13 = vpop.f32.mrf.mxu2 }
 0x63a   : > { %v1592_v15 = vadd.f32 %v2313_v12, %v1591_v13 }
 0x63c   : > { %v1595_v16 = vadd.f32 %v1592_v15, %v2671_v27 }
 0x63e   : > { %v1596_v26 = vpack.c.bf16 %v1595_v16, %v1595_v16 }
 0x640   : > { %2191 = vmatmul.msk.bf16.vlgmr.msra.gmra.mxu0 %vm1187_vm1, %v1596_v26 }
 0x641   : > { %v1593_v17 = vpop.f32.mrf.mxu2 }
 0x6bd   : > { %v1645_v19 = vpop.f32.mrf.mxu0 }
 0x6be   : > { %v1646_v20 = vadd.f32 %v2314_v18, %v1645_v19 }
 0x6c0   : > { %1654 = vrot.lane.b32.xlu0 %v1646_v20, %s2914_s30  ;;  %v1650_v21 = vrot.slane %v1646_v20, 4 }
 0x6c2   : > { %1657 = vrot.lane.b32.xlu1 %v1650_v21, %s2369_s11  ;;  %1651 = vrot.lane.b32.xlu2 %v1650_v21, %s2370_s4  ;;  %s2915_s11 = sshll.u32 %s2918_s8, 3 }
 0x6c3   : > { %s823_s2 = scalar_lea.vmem %s2880_s27, %s2915_s11 }
 0x6c5   : > { %v1647_v22 = vpop.f32.mrf.mxu0 }
 0x71c   : > { %v1652_v27 = vpop.permute.xlu2 %1651 }
 0x71d   : > { %v1661_v23 = vsel %vm1660_vm15, %v1646_v20, %v1652_v27 }
 0x71e   : > { %v2782_v24 = vadd.f32 %v1661_v23, %v2655_v9 }
 0x720   : > { %v1681_v31 = vsel %vm1014_vm0, %v2782_v24, 0.0 }
 0x721   : > { %1682 = vadd.xlane.f32.xlu2 %v1681_v31 }
 0x732   : > { %v1655_v25 = vpop.permute.xlu0 %1654 }
 0x734   : > { %v1658_v28 = vpop.permute.xlu1 %1657 }
 0x735   : > { %v1662_v29 = vsel %vm1660_vm15, %v1655_v25, %v1658_v28 }
 0x736   : > { %v2787_v30 = vadd.f32 %v1662_v29, %v2662_v14 }
 0x738   : > { %v1684_v32 = vsel %vm1014_vm0, %v2787_v30, 0.0 }
 0x739   : > { %1685 = vadd.xlane.f32.xlu0 %v1684_v32 }
 0x794   : > { %v1683_v33 = vpop.xlane.xlu2 %1682 }
 0x795   : > { %v1687_v34 = vmul.f32 %v1683_v33, %v2586_v39 }
 0x797   : > { %v1689_v9 = vsub.f32 %v2782_v24, %v1687_v34 }
 0x799   : > { %v1691_v35 = vmul.f32 %v1689_v9, %v1689_v9 }
 0x79b   : > { %v1693_v36 = vsel %vm1014_vm0, %v1691_v35, 0.0 }
 0x79c   : > { %1694 = vadd.xlane.f32.xlu1 %v1693_v36 }
 0x7ac   : > { %v1686_v37 = vpop.xlane.xlu0 %1685 }
 0x7ad   : > { %v1688_v38 = vmul.f32 %v1686_v37, %v2586_v39 }
 0x7af   : > { %v1690_v40 = vsub.f32 %v2787_v30, %v1688_v38 }
 0x7b1   : > { %v1692_v14 = vmul.f32 %v1690_v40, %v1690_v40 }
 0x7b3   : > { %v1696_v41 = vsel %vm1014_vm0, %v1692_v14, 0.0 }
 0x7b4   : > { %1697 = vadd.xlane.f32.xlu2 %v1696_v41 }
 0x80f   : > { %v1695_v42 = vpop.xlane.xlu1 %1694 }
 0x810   : > { %v1699_v43 = vmul.f32 %v1695_v42, %v2586_v39 }
 0x812   : > { %v1701_v44 = vadd.f32 1e-05, %v1699_v43 }
 0x814   : > { %2346 = vrsqrt.f32 %v1701_v44  ;;  %vm1709_vm3 = vweird.f32 %v1701_v44 }
 0x81a   : > { %v2347_v46 = vpop.eup %2346 }
 0x81b   : > { %v1704_v48 = vmul.f32 %v2347_v46, %v1701_v44  ;;  %vm1710_vm2 = vweird.f32 %v2347_v46  ;;  %v2289_v44 = vld [vmem:[%s2876_s23 + $0x18] sm:$0xff] }
 0x81c   : > { %vm1711_vm4 = vmor %vm1709_vm3, %vm1710_vm2  ;;  %1853 = vmatpush.bf16.msrb.mxu3 %v2289_v44 }
 0x81d   : > { %v1705_v49 = vmul.f32 %v2347_v46, %v1704_v48  ;;  %v2291_v48 = vld [vmem:[%s2878_s25 + $0x8] sm:$0xff] }
 0x81e   : > { %1895 = vmatpush.bf16.msrb.mxu0 %v2291_v48 }
 0x81f   : > { %v1706_v53 = vmul.f32 0.5, %v1705_v49 }
 0x820   : > { %1854 = vmatpush.bf16.msrb.mxu3 %v2288_v45 }
 0x821   : > { %v1707_v54 = vsub.f32 1.5, %v1706_v53 }
 0x823   : > { %v1708_v56 = vmul.f32 %v2347_v46, %v1707_v54  ;;  %v2290_v54 = vld [vmem:[%s2878_s25] sm:$0xff] }
 0x824   : > { %1896 = vmatpush.bf16.msrb.mxu0 %v2290_v54 }
 0x825   : > { %v1712_v59 = vsel %vm1711_vm4, %v2347_v46, %v1708_v56  ;;  %v2287_v46 = vld [vmem:[%s2876_s23 + $0x8] sm:$0xff]  ;;  %v2318_v56 = vld [vmem:[%s2877_s24] ss:$0 sm:$0xff] }
 0x826   : > { %1855 = vmatpush.bf16.msrb.mxu3 %v2287_v46 }
 0x827   : > { %v1698_v50 = vpop.xlane.xlu2 %1697 }
 0x828   : > { %v1700_v51 = vmul.f32 %v1698_v50, %v2586_v39  ;;  %v1723_v39 = vmul.f32 %v1712_v59, %v1689_v9 }
 0x82a   : > { %v1702_v52 = vadd.f32 1e-05, %v1700_v51  ;;  %v1728_v2 = vmul.f32 %v2315_v62, %v1723_v39  ;;  %1856 = vmatpush.bf16.msrb.mxu3 %v2286_v47  ;;  %v2319_v39 = vld [vmem:[%s2879_s26] ss:$0 sm:$0xff] }
 0x82c   : > { %2348 = vrsqrt.f32 %v1702_v52  ;;  %vm1719_vm6 = vweird.f32 %v1702_v52  ;;  %v1733_v5 = vadd.f32 %v2316_v1, %v1728_v2 }
 0x832   : > { %v2349_v55 = vpop.eup %2348 }
 0x833   : > { %v1714_v57 = vmul.f32 %v2349_v55, %v1702_v52  ;;  %vm1720_vm5 = vweird.f32 %v2349_v55 }
 0x834   : > { %vm1721_vm7 = vmor %vm1719_vm6, %vm1720_vm5 }
 0x835   : > { %v1715_v58 = vmul.f32 %v2349_v55, %v1714_v57 }
 0x837   : > { %v1716_v60 = vmul.f32 0.5, %v1715_v58 }
 0x839   : > { %v1717_v61 = vsub.f32 1.5, %v1716_v60 }
 0x83b   : > { %v1718_v63 = vmul.f32 %v2349_v55, %v1717_v61 }
 0x83d   : > { %v1722_v0 = vsel %vm1721_vm7, %v2349_v55, %v1718_v63 }
 0x83e   : > { %v1724_v3 = vmul.f32 %v1722_v0, %v1690_v40 }
 0x840   : > { %v1729_v4 = vmul.f32 %v2315_v62, %v1724_v3 }
 0x842   : > { %v1734_v6 = vadd.f32 %v2316_v1, %v1729_v4 }
 0x844   : > { %v1735_v7 = vpack.c.bf16 %v1734_v6, %v1733_v5 }
 0x846   : > { %2200 = vmatmul.msk.bf16.vlgmr.msra.gmra.mxu1 %vm1014_vm0, %v1735_v7 }
 0x8c3   : > { %v1763_v10 = vpop.f32.mrf.mxu1 }
 0x8c4   : > { %v1764_v11 = vadd.f32 %v2317_v8, %v1763_v10 }
 0x8c6   : > { %v2201_v12 = vmul.f32 -1.442695, %v1764_v11 }
 0x8c8   : > { %2350 = vpow2.f32 %v2201_v12 }
 0x8cb   : > { %v1765_v13 = vpop.f32.mrf.mxu1 }
 0x8cc   : > { %v1766_v15 = vadd.f32 %v2317_v8, %v1765_v13 }
 0x8ce   : > { %v2351_v16 = vpop.eup %2350  ;;  %v2202_v26 = vmul.f32 -1.442695, %v1766_v15 }
 0x8cf   : > { %v1774_v17 = vadd.f32 1.0, %v2351_v16 }
 0x8d0   : > { %2352 = vpow2.f32 %v2202_v26 }
 0x8d1   : > { %2354 = vrcp.f32 %v1774_v17  ;;  %v1787_v27 = vand.u32 2147483648, %v1774_v17  ;;  %v1785_v31 = vand.u32 2147483647, %v1774_v17  ;;  %vm1781_vm9 = vweird.f32 %v1774_v17 }
 0x8d3   : > { %v1788_v29 = vor.u32 1.1754944e-38, %v1787_v27  ;;  %vm1786_vm11 = vcmp.eq.f32.partialorder %v1785_v31, 8.507059e+37 }
 0x8d6   : > { %v2353_v18 = vpop.eup %2352 }
 0x8d7   : > { %v2355_v19 = vpop.eup %2354  ;;  %v1775_v20 = vadd.f32 1.0, %v2353_v18 }
 0x8d8   : > { %v1777_v21 = vmul.f32 %v2355_v19, %v1774_v17  ;;  %vm1782_vm8 = vweird.f32 %v2355_v19 }
 0x8d9   : > { %2356 = vrcp.f32 %v1775_v20  ;;  %vm1783_vm10 = vmor %vm1781_vm9, %vm1782_vm8  ;;  %v1802_v36 = vand.u32 2147483648, %v1775_v20  ;;  %v1800_v38 = vand.u32 2147483647, %v1775_v20  ;;  %vm1796_vm13 = vweird.f32 %v1775_v20 }
 0x8da   : > { %v1778_v22 = vsub.f32 1.0, %v1777_v21 }
 0x8db   : > { %v1803_v14 = vor.u32 1.1754944e-38, %v1802_v36  ;;  %vm1801_vm15 = vcmp.eq.f32.partialorder %v1800_v38, 8.507059e+37 }
 0x8dc   : > { %v1779_v23 = vmul.f32 %v2355_v19, %v1778_v22 }
 0x8de   : > { %v1780_v25 = vadd.f32 %v2355_v19, %v1779_v23 }
 0x8df   : > { %v2357_v28 = vpop.eup %2356 }
 0x8e0   : > { %v1784_v32 = vsel %vm1783_vm10, %v2355_v19, %v1780_v25  ;;  %v1792_v33 = vmul.f32 %v2357_v28, %v1775_v20  ;;  %vm1797_vm12 = vweird.f32 %v2357_v28 }
 0x8e1   : > { %v1789_v34 = vsel %vm1786_vm11, %v1788_v29, %v1784_v32  ;;  %vm1798_vm14 = vmor %vm1796_vm13, %vm1797_vm12 }
 0x8e2   : > { %v1806_v9 = vmul.f32 %v1789_v34, %v1764_v11  ;;  %v1793_v35 = vsub.f32 1.0, %v1792_v33 }
 0x8e4   : > { %v1794_v37 = vmul.f32 %v2357_v28, %v1793_v35  ;;  %1810 = vrot.lane.b32.xlu2 %v1806_v9, %s2914_s30 }
 0x8e6   : > { %v1795_v40 = vadd.f32 %v2357_v28, %v1794_v37 }
 0x8e8   : > { %v1799_v41 = vsel %vm1798_vm14, %v2357_v28, %v1795_v40 }
 0x8e9   : > { %v1804_v42 = vsel %vm1801_vm15, %v1803_v14, %v1799_v41 }
 0x8ea   : > { %v1807_v43 = vmul.f32 %v1804_v42, %v1766_v15 }
 0x8ec   : > { %1812 = vrot.lane.b32.xlu0 %v1807_v43, %s2914_s30 }
 0x93e   : > { %v1811_v49 = vpop.permute.xlu2 %1810 }
 0x93f   : > { %v1816_v51 = vmul.f32 %v1811_v49, %v1806_v9 }
 0x95e   : > { %v1813_v50 = vpop.permute.xlu0 %1812 }
 0x95f   : > { %v1817_v52 = vmul.f32 %v1813_v50, %v1807_v43 }
 0x961   : > { %v1818_v53 = vpack.c.bf16 %v1817_v52, %v1816_v51 }
 0x963   : > { %2219 = vmatmul.msk.bf16.vlgmr.msrb.gmra.mxu3 %vm1187_vm1, %v1818_v53 }
 0x9e6   : > { %v1858_v55 = vpop.f32.mrf.mxu3 }
 0x9e7   : > { %v1859_v57 = vadd.f32 %v2318_v56, %v1858_v55 }
 0x9e9   : > { %v1863_v60 = vadd.f32 %v1859_v57, %v2782_v24 }
 0x9ee   : > { %v1860_v58 = vpop.f32.mrf.mxu3 }
 0x9ef   : > { %v1861_v59 = vadd.f32 %v2318_v56, %v1860_v58 }
 0x9f1   : > { %v1864_v61 = vadd.f32 %v1861_v59, %v2787_v30 }
 0x9f3   : > { %v1865_v62 = vpack.c.bf16 %v1864_v61, %v1863_v60 }
 0x9f5   : > { %2228 = vmatmul.msk.bf16.vlgmr.msrb.gmra.mxu0 %vm1014_vm0, %v1865_v62 }
 0xa72   : > { %v1898_v63 = vpop.f32.mrf.mxu0 }
 0xa73   : > { %v1899_v0 = vadd.f32 %v2319_v39, %v1898_v63 }
 0xa75   : > { %1903 = vst [vmem:[%s823_s2] sm:$0xff] %v1899_v0 }
 0xa7a   : > { %v1900_v1 = vpop.f32.mrf.mxu0 }
 0xa7b   : > { %v1901_v2 = vadd.f32 %v2319_v39, %v1900_v1 }
 0xa7d   : > { %1904 = vst [vmem:[%s823_s2 + $0x8] sm:$0xff] %v1901_v2 }
 0xa7e PF: > { %s2916_s3 = sld [smem:[#allocation2_spill]] }
 0xa84   : > { %s37_s7 = sadd.s32 1, %s2916_s3  }
 0xa85   : > { %p34_p4 = scmp.ge.s32.totalorder %s37_s7, 4  }
 0xa87   :  { %36 = sbr.rel (!%p34_p4) target bundleno = 13 (0xd), region = 158 }

</bundles_post_ra>
